<compile_context>
chip_gen: v6e
topology: v6e:2x2x1
jax: 0.10.0
libtpu: 0.0.40
codegen_flags: <defaults>
</compile_context>

<pallas_src>
import functools
import math

import jax
import jax.numpy as jnp
from jax import lax
from jax.experimental import pallas as pl
from jax.experimental.pallas import tpu as pltpu


_VMEM_LIMIT = 32 * 1024 * 1024    # safe on v5e / v6e / v7x for the tiles used here


# ----------------------------------------------------------------------------
# Tiling helpers
# ----------------------------------------------------------------------------
def _round_up(x, m):
    return (x + m - 1) // m * m


def _pick_tm(m):
    if m >= 8192:
        return 1024
    return min(512, _round_up(m, 8))


def _pick_tile(n, cap):
    """Largest tile <= cap that is a multiple of 128 and divides n, else full n."""
    if n <= cap:
        return n
    for t in range(cap, 127, -128):
        if n % t == 0:
            return t
    return n


def _pick_th(h):
    """Largest divisor of h that is <= 32 (row-block height for the deconvs)."""
    for d in range(min(32, h), 0, -1):
        if h % d == 0:
            return d
    return 1


# ----------------------------------------------------------------------------
# Fused matmul kernels: out = act(A @ W + bias [+ residual])
# ----------------------------------------------------------------------------
def _matmul_kernel_acc(*refs, activation, has_residual):
    if has_residual:
        a_ref, b_ref, bias_ref, res_ref, o_ref, acc_ref = refs
    else:
        a_ref, b_ref, bias_ref, o_ref, acc_ref = refs
        res_ref = None
    k = pl.program_id(2)

    @pl.when(k == 0)
    def _():
        acc_ref[...] = jnp.broadcast_to(bias_ref[...], acc_ref.shape)

    acc_ref[...] += jnp.dot(a_ref[...], b_ref[...],
                            preferred_element_type=jnp.float32)

    @pl.when(k == pl.num_programs(2) - 1)
    def _():
        out = acc_ref[...]
        if has_residual:
            out = out + res_ref[...].astype(jnp.float32)
        if activation == "relu":
            out = jnp.maximum(out, 0.0)
        elif activation == "sigmoid":
            out = jax.nn.sigmoid(out)
        o_ref[...] = out.astype(o_ref.dtype)


def _matmul_kernel_direct(*refs, activation, has_residual):
    # single k step: no accumulator scratch, write the epilogue directly
    if has_residual:
        a_ref, b_ref, bias_ref, res_ref, o_ref = refs
    else:
        a_ref, b_ref, bias_ref, o_ref = refs
        res_ref = None
    out = jnp.dot(a_ref[...], b_ref[...], preferred_element_type=jnp.float32)
    out = out + bias_ref[...]
    if has_residual:
        out = out + res_ref[...].astype(jnp.float32)
    if activation == "relu":
        out = jnp.maximum(out, 0.0)
    elif activation == "sigmoid":
        out = jax.nn.sigmoid(out)
    o_ref[...] = out.astype(o_ref.dtype)


@functools.partial(jax.jit, static_argnames=("activation", "out_dtype"))
def pallas_linear(a, w, b=None, residual=None, *, activation=None,
                  out_dtype=jnp.float32):
    """out = act(a @ w + b [+ residual]); a:(M,K) w:(K,N) b:(N,)."""
    M, K = a.shape
    K2, N = w.shape
    assert K == K2
    a = a.astype(jnp.bfloat16)
    w = w.astype(jnp.bfloat16)          # no-op when weights are pre-cast
    if b is None:
        b = jnp.zeros((N,), jnp.float32)
    b = b.astype(jnp.float32).reshape(1, N)

    tm = _pick_tm(M)
    tn = _pick_tile(N, 512)
    tk = _pick_tile(K, 1024)
    nk = pl.cdiv(K, tk)
    has_residual = residual is not None

    if nk == 1:
        in_specs = [
            pl.BlockSpec((tm, K), lambda i, j: (i, 0)),
            pl.BlockSpec((K, tn), lambda i, j: (0, j)),
            pl.BlockSpec((1, tn), lambda i, j: (0, j)),
        ]
        args = [a, w, b]
        if has_residual:
            in_specs.append(pl.BlockSpec((tm, tn), lambda i, j: (i, j)))
            args.append(residual.astype(jnp.bfloat16))
        return pl.pallas_call(
            functools.partial(_matmul_kernel_direct, activation=activation,
                              has_residual=has_residual),
            out_shape=jax.ShapeDtypeStruct((M, N), out_dtype),
            grid_spec=pltpu.PrefetchScalarGridSpec(
                num_scalar_prefetch=0,
                grid=(pl.cdiv(M, tm), pl.cdiv(N, tn)),
                in_specs=in_specs,
                out_specs=pl.BlockSpec((tm, tn), lambda i, j: (i, j)),
            ),
            compiler_params=pltpu.CompilerParams(
                dimension_semantics=("parallel", "parallel"),
                vmem_limit_bytes=_VMEM_LIMIT),
        )(*args)

    in_specs = [
        pl.BlockSpec((tm, tk), lambda i, j, k: (i, k)),
        pl.BlockSpec((tk, tn), lambda i, j, k: (k, j)),
        pl.BlockSpec((1, tn), lambda i, j, k: (0, j)),
    ]
    args = [a, w, b]
    if has_residual:
        in_specs.append(pl.BlockSpec((tm, tn), lambda i, j, k: (i, j)))
        args.append(residual.astype(jnp.bfloat16))
    return pl.pallas_call(
        functools.partial(_matmul_kernel_acc, activation=activation,
                          has_residual=has_residual),
        out_shape=jax.ShapeDtypeStruct((M, N), out_dtype),
        grid_spec=pltpu.PrefetchScalarGridSpec(
            num_scalar_prefetch=0,
            grid=(pl.cdiv(M, tm), pl.cdiv(N, tn), nk),
            in_specs=in_specs,
            out_specs=pl.BlockSpec((tm, tn), lambda i, j, k: (i, j)),
            scratch_shapes=[pltpu.VMEM((tm, tn), jnp.float32)],
        ),
        compiler_params=pltpu.CompilerParams(
            dimension_semantics=("parallel", "parallel", "arbitrary"),
            vmem_limit_bytes=_VMEM_LIMIT),
    )(*args)


# ----------------------------------------------------------------------------
# Attention kernel
# ----------------------------------------------------------------------------
def _attn_kernel(q_ref, k_ref, v_ref, o_ref, *, scale):
    q = q_ref[...]
    k = k_ref[...]
    v = v_ref[...]
    s = lax.dot_general(q, k, (((1,), (1,)), ((), ())),
                        preferred_element_type=jnp.float32) * scale
    s = s - jnp.max(s, axis=-1, keepdims=True)
    p = jnp.exp(s)
    p = p * pl.reciprocal(jnp.sum(p, axis=-1, keepdims=True), approx=True)
    o_ref[...] = jnp.dot(p.astype(v.dtype), v, preferred_element_type=jnp.float32)


@functools.partial(jax.jit, static_argnames=("scale",))
def pallas_attention(q, k, v, *, scale):
    """q:(BH,Sq,hd) k,v:(BH,Skv,hd) -> softmax(q k^T * scale) v  (f32)."""
    BH, Sq, hd = q.shape
    Skv = k.shape[1]
    return pl.pallas_call(
        functools.partial(_attn_kernel, scale=scale),
        out_shape=jax.ShapeDtypeStruct((BH, Sq, hd), jnp.float32),
        grid=(BH,),
        in_specs=[
            pl.BlockSpec((None, Sq, hd), lambda i: (i, 0, 0)),
            pl.BlockSpec((None, Skv, hd), lambda i: (i, 0, 0)),
            pl.BlockSpec((None, Skv, hd), lambda i: (i, 0, 0)),
        ],
        out_specs=pl.BlockSpec((None, Sq, hd), lambda i: (i, 0, 0)),
        compiler_params=pltpu.CompilerParams(
            dimension_semantics=("parallel",), vmem_limit_bytes=_VMEM_LIMIT),
    )(q.astype(jnp.bfloat16), k.astype(jnp.bfloat16), v.astype(jnp.bfloat16))


# ----------------------------------------------------------------------------
# LayerNorm(x + y) kernel (row tiled)
# ----------------------------------------------------------------------------
def _ln_add_kernel(x_ref, y_ref, g_ref, b_ref, o_ref, *, eps):
    z = x_ref[...] + y_ref[...]
    mu = jnp.mean(z, axis=-1, keepdims=True)
    var = jnp.mean(jnp.square(z - mu), axis=-1, keepdims=True)
    zn = (z - mu) * lax.rsqrt(var + eps)
    o_ref[...] = zn * g_ref[...] + b_ref[...]


@jax.jit
def pallas_layernorm_add(x, y, gamma, beta, eps=1e-5):
    R, E = x.shape
    tr = min(256, _round_up(R, 8))
    return pl.pallas_call(
        functools.partial(_ln_add_kernel, eps=eps),
        out_shape=jax.ShapeDtypeStruct((R, E), jnp.float32),
        grid=(pl.cdiv(R, tr),),
        in_specs=[
            pl.BlockSpec((tr, E), lambda i: (i, 0)),
            pl.BlockSpec((tr, E), lambda i: (i, 0)),
            pl.BlockSpec((1, E), lambda i: (0, 0)),
            pl.BlockSpec((1, E), lambda i: (0, 0)),
        ],
        out_specs=pl.BlockSpec((tr, E), lambda i: (i, 0)),
        compiler_params=pltpu.CompilerParams(
            dimension_semantics=("parallel",), vmem_limit_bytes=_VMEM_LIMIT),
    )(x.astype(jnp.float32), y.astype(jnp.float32),
      gamma.reshape(1, E).astype(jnp.float32),
      beta.reshape(1, E).astype(jnp.float32))


# ----------------------------------------------------------------------------
# Fused 3x3 stride-1 pad-1 conv (+BN +ReLU): flat shift-and-accumulate
# ----------------------------------------------------------------------------
def _conv3x3_kernel(x_ref, w_ref, b_ref, o_ref, *, wp):
    m = pl.program_id(1)
    tm = o_ref.shape[0]
    base = m * tm
    acc = None
    for kh in range(3):
        for kw in range(3):
            a = x_ref[pl.ds(base + kh * wp + kw, tm), :]
            d = jnp.dot(a, w_ref[kh * 3 + kw], preferred_element_type=jnp.float32)
            acc = d if acc is None else acc + d
    acc = acc + b_ref[...]
    o_ref[...] = jnp.maximum(acc, 0.0).astype(o_ref.dtype)


@jax.jit
def pallas_conv3x3_s1(x, w9, b):
    """3x3 / stride 1 / pad 1 conv + folded-BN bias + ReLU on NHWC bf16.

    The padded activation is read once from HBM; the 9 taps are shifted views
    of a flat padded raster taken in-VMEM (no im2col duplication)."""
    B, H, W, Cin = x.shape
    Cout = w9.shape[-1]
    wp = W + 2
    P = H * wp
    tm = min(512, _round_up(P, 8))
    nm = pl.cdiv(P, tm)
    flat_len = nm * tm + 2 * wp + 2
    xp = jnp.pad(x.astype(jnp.bfloat16), ((0, 0), (1, 1), (1, 1), (0, 0)))
    xf = xp.reshape(B, (H + 2) * wp, Cin)
    extra = flat_len - (H + 2) * wp
    if extra > 0:
        xf = jnp.pad(xf, ((0, 0), (0, extra), (0, 0)))
    out = pl.pallas_call(
        functools.partial(_conv3x3_kernel, wp=wp),
        out_shape=jax.ShapeDtypeStruct((B, nm * tm, Cout), jnp.bfloat16),
        grid_spec=pltpu.PrefetchScalarGridSpec(
            num_scalar_prefetch=0,
            grid=(B, nm),
            in_specs=[
                pl.BlockSpec((None, flat_len, Cin), lambda b_, m_: (b_, 0, 0)),
                pl.BlockSpec((9, Cin, Cout), lambda b_, m_: (0, 0, 0)),
                pl.BlockSpec((1, Cout), lambda b_, m_: (0, 0)),
            ],
            out_specs=pl.BlockSpec((None, tm, Cout), lambda b_, m_: (b_, m_, 0)),
        ),
        compiler_params=pltpu.CompilerParams(
            dimension_semantics=("parallel", "parallel"),
            vmem_limit_bytes=_VMEM_LIMIT),
    )(xf, w9, b.reshape(1, Cout).astype(jnp.float32))
    # drop the padded-raster garbage columns
    # TODO(synk): at very large resolutions the whole-image resident block
    # should be split into halo'd row blocks instead.
    return out[:, :P, :].reshape(B, H, wp, Cout)[:, :, :W, :]


# ----------------------------------------------------------------------------
# Stride-2 deconv (k=4, s=2, p=1) + BN + ReLU [+ fused 1x1 conv + sigmoid]
# ----------------------------------------------------------------------------
def _deconv_s2_kernel(*refs, w_out, th, head):
    if head:
        slab_ref, w_ref, b1_ref, w2_ref, b2_ref, o_ref = refs
    else:
        slab_ref, w_ref, b1_ref, o_ref = refs
        w2_ref = b2_ref = None

    def body(u, carry):
        rows = [slab_ref[u + dy] for dy in range(3)]            # (Wp, Cin) each
        sh = {}
        for dy in range(3):
            for sx in range(3):
                sh[(dy, sx)] = rows[dy][sx:sx + w_out, :]       # (W, Cin)
        for ry in range(2):
            parts = []
            for rx in range(2):
                a = jnp.concatenate(
                    [sh[(ry + ty, rx + tx)] for ty in range(2) for tx in range(2)],
                    axis=-1)                                    # (W, 4*Cin)
                acc = jnp.dot(a, w_ref[2 * ry + rx],
                              preferred_element_type=jnp.float32)
                acc = jnp.maximum(acc + b1_ref[...], 0.0)       # deconv + BN + ReLU
                if head:
                    y = jnp.dot(acc.astype(jnp.bfloat16), w2_ref[...],
                                preferred_element_type=jnp.float32)
                    parts.append(jax.nn.sigmoid(y + b2_ref[...]))
                else:
                    parts.append(acc.astype(o_ref.dtype))
            o_ref[2 * u + ry] = jnp.concatenate(parts, axis=-1)
        return carry

    lax.fori_loop(0, th, body, 0)


def _deconv_s2_call(x, w4, b1, head_w=None, head_b=None):
    B, H, W, Cin = x.shape
    Cout = w4.shape[-1]
    th = _pick_th(H)
    nblk = H // th
    wp = W + 2
    # halo'd row slabs (8% duplication) so the kernel reads the activation ~1x
    xp = jnp.pad(x.astype(jnp.bfloat16), ((0, 0), (1, 1), (1, 1), (0, 0)))
    slabs = jnp.stack([xp[:, i * th:i * th + th + 2] for i in range(nblk)],
                      axis=1).reshape(B * nblk, th + 2, wp, Cin)

    head = head_w is not None
    out_c = head_w.shape[-1] if head else Cout
    out_dt = jnp.float32 if head else jnp.bfloat16

    in_specs = [
        pl.BlockSpec((None, th + 2, wp, Cin), lambda n: (n, 0, 0, 0)),
        pl.BlockSpec((4, 4 * Cin, Cout), lambda n: (0, 0, 0)),
        pl.BlockSpec((1, Cout), lambda n: (0, 0)),
    ]
    args = [slabs, w4, b1.reshape(1, Cout).astype(jnp.float32)]
    if head:
        J = out_c
        in_specs += [
            pl.BlockSpec((Cout, J), lambda n: (0, 0)),
            pl.BlockSpec((1, J), lambda n: (0, 0)),
        ]
        args += [head_w.astype(jnp.bfloat16),
                 head_b.reshape(1, J).astype(jnp.float32)]

    out = pl.pallas_call(
        functools.partial(_deconv_s2_kernel, w_out=W, th=th, head=head),
        out_shape=jax.ShapeDtypeStruct((B, 2 * H, W, 2 * out_c), out_dt),
        grid_spec=pltpu.PrefetchScalarGridSpec(
            num_scalar_prefetch=0,
            grid=(B * nblk,),
            in_specs=in_specs,
            out_specs=pl.BlockSpec((None, 2 * th, W, 2 * out_c),
                                   lambda n: (n // nblk, n % nblk, 0, 0)),
        ),
        compiler_params=pltpu.CompilerParams(
            dimension_semantics=("parallel",),
            vmem_limit_bytes=_VMEM_LIMIT),
    )(*args)
    # (B, 2H, W, 2, C) -> (B, 2H, 2W, C): zero-copy reshape (column phase is
    # packed right next to the channel dim, so no transpose is needed).
    return out.reshape(B, 2 * H, 2 * W, out_c)


@jax.jit
def deconv_stride2_k4(x, w4, b1):
    return _deconv_s2_call(x, w4, b1)


@jax.jit
def deconv_stride2_k4_head(x, w4, b1, wf, bf):
    return _deconv_s2_call(x, w4, b1, wf, bf)


# ----------------------------------------------------------------------------
# ConvTranspose2d(k=5, s=5) + BN + ReLU (exact block-expansion matmul)
# ----------------------------------------------------------------------------
@jax.jit
def deconv_stride5_k5(x, w, b):
    """Weight columns ordered (kh,kw,cout) so the minor output dim is already
    Cout and the post-matmul permutation only touches major dims."""
    B, H, W, Cin = x.shape
    Cout = w.shape[1] // 25
    y = pallas_linear(x.reshape(B * H * W, Cin), w, b,
                      activation="relu", out_dtype=jnp.bfloat16)
    y = y.reshape(B, H, W, 5, 5, Cout).transpose(0, 1, 3, 2, 4, 5)
    return y.reshape(B, 5 * H, 5 * W, Cout)


# ----------------------------------------------------------------------------
# Remaining conv glue (stem 7x7, three stride-2 3x3 convs, 1x1 convs)
# ----------------------------------------------------------------------------
def im2col(x, kh, kw, stride, pad):
    B, H, W, C = x.shape
    if pad:
        x = jnp.pad(x, ((0, 0), (pad, pad), (pad, pad), (0, 0)))
    Ho = (H + 2 * pad - kh) // stride + 1
    Wo = (W + 2 * pad - kw) // stride + 1
    cols = []
    for i in range(kh):
        for j in range(kw):
            cols.append(x[:, i:i + stride * (Ho - 1) + 1:stride,
                          j:j + stride * (Wo - 1) + 1:stride, :])
    A = cols[0] if len(cols) == 1 else jnp.concatenate(cols, axis=-1)
    return A.reshape(B * Ho * Wo, kh * kw * C), Ho, Wo


@functools.partial(jax.jit, static_argnames=("k", "stride", "pad", "act"))
def conv_im2col(x, pw, *, k, stride, pad, act="relu"):
    # TODO(synk): only the 7x7 stem and the three stride-2 3x3 convs still use
    # im2col patch duplication; all other convs read their activation once.
    B = x.shape[0]
    A, Ho, Wo = im2col(x.astype(jnp.bfloat16), k, k, stride, pad)
    y = pallas_linear(A, pw["w"], pw["b"], activation=act, out_dtype=jnp.bfloat16)
    return y.reshape(B, Ho, Wo, -1)


def conv1x1(x, pw, *, stride=1, act=None, residual=None):
    if stride != 1:
        x = x[:, ::stride, ::stride, :]
    B, H, W, C = x.shape
    res = None if residual is None else residual.reshape(B * H * W, -1)
    y = pallas_linear(x.reshape(B * H * W, C), pw["w"], pw["b"], res,
                      activation=act, out_dtype=jnp.bfloat16)
    return y.reshape(B, H, W, -1)


def maxpool_3x3_s2_p1(x):
    # TODO(synk): maxpool left to XLA reduce_window (windowed-reduction glue).
    return lax.reduce_window(x, jnp.array(-jnp.inf, x.dtype), lax.max,
                             (1, 3, 3, 1), (1, 2, 2, 1),
                             ((0, 0), (1, 1), (1, 1), (0, 0)))


# ----------------------------------------------------------------------------
# ResNet-50 backbone (BN folded into the prepared weights)
# ----------------------------------------------------------------------------
@functools.partial(jax.jit, static_argnames=("stride",))
def bottleneck(x, p, stride):
    out = conv1x1(x, p["conv1"], act="relu")
    if stride == 1:
        w2 = p["conv2"]["w"]
        out = pallas_conv3x3_s1(out, w2.reshape(9, w2.shape[0] // 9, w2.shape[1]),
                                p["conv2"]["b"])
    else:
        out = conv_im2col(out, p["conv2"], k=3, stride=stride, pad=1, act="relu")
    if "down" in p:
        identity = conv1x1(x, p["down"], stride=stride, act=None)
    else:
        identity = x
    # residual add + ReLU fused into the conv3 matmul epilogue
    return conv1x1(out, p["conv3"], act="relu", residual=identity)


def resnet50_forward(x, p):
    x = conv_im2col(x, p["stem"], k=7, stride=2, pad=3, act="relu")
    x = maxpool_3x3_s2_p1(x)
    for li, name in enumerate(("layer1", "layer2", "layer3", "layer4")):
        stride = 1 if li == 0 else 2
        for bi, blk in enumerate(p[name]):
            x = bottleneck(x, blk, stride=stride if bi == 0 else 1)
    return x


# ----------------------------------------------------------------------------
# Transformer (post-norm encoder/decoder layers, eval mode, fused QKV / KV)
# ----------------------------------------------------------------------------
def self_attention(x, p, nheads):
    S, B, E = x.shape
    hd = E // nheads
    qkv = pallas_linear(x.reshape(S * B, E), p["w_qkv"], p["b_qkv"])
    qkv = qkv.reshape(S, B, 3, nheads, hd)

    def heads(t):
        return t.transpose(1, 2, 0, 3).reshape(B * nheads, S, hd)

    o = pallas_attention(heads(qkv[:, :, 0]), heads(qkv[:, :, 1]),
                         heads(qkv[:, :, 2]), scale=1.0 / math.sqrt(hd))
    o = o.reshape(B, nheads, S, hd).transpose(2, 0, 1, 3).reshape(S * B, E)
    return pallas_linear(o, p["wo"], p["bo"]).reshape(S, B, E)


def cross_attention(q_in, kv_in, p, nheads):
    Sq, B, E = q_in.shape
    Skv = kv_in.shape[0]
    hd = E // nheads
    q = pallas_linear(q_in.reshape(Sq * B, E), p["wq"], p["bq"])
    q = q.reshape(Sq, B, nheads, hd).transpose(1, 2, 0, 3).reshape(B * nheads, Sq, hd)
    kv = pallas_linear(kv_in.reshape(Skv * B, E), p["w_kv"], p["b_kv"])
    kv = kv.reshape(Skv, B, 2, nheads, hd)

    def heads(t):
        return t.transpose(1, 2, 0, 3).reshape(B * nheads, Skv, hd)

    o = pallas_attention(q, heads(kv[:, :, 0]), heads(kv[:, :, 1]),
                         scale=1.0 / math.sqrt(hd))
    o = o.reshape(B, nheads, Sq, hd).transpose(2, 0, 1, 3).reshape(Sq * B, E)
    return pallas_linear(o, p["wo"], p["bo"]).reshape(Sq, B, E)


@functools.partial(jax.jit, static_argnames=("nheads",))
def encoder_layer(src, p, nheads):
    S, B, E = src.shape
    a = self_attention(src, p["self_attn"], nheads)
    src = pallas_layernorm_add(src.reshape(S * B, E), a.reshape(S * B, E),
                               p["ln1_g"], p["ln1_b"]).reshape(S, B, E)
    h1 = pallas_linear(src.reshape(S * B, E), p["w1"], p["b1"], activation="relu")
    h2 = pallas_linear(h1, p["w2"], p["b2"])
    src = pallas_layernorm_add(src.reshape(S * B, E), h2,
                               p["ln2_g"], p["ln2_b"]).reshape(S, B, E)
    return src


@functools.partial(jax.jit, static_argnames=("nheads",))
def decoder_layer(tgt, mem, p, nheads):
    S, B, E = tgt.shape
    a = self_attention(tgt, p["self_attn"], nheads)
    tgt = pallas_layernorm_add(tgt.reshape(S * B, E), a.reshape(S * B, E),
                               p["ln1_g"], p["ln1_b"]).reshape(S, B, E)
    a = cross_attention(tgt, mem, p["cross_attn"], nheads)
    tgt = pallas_layernorm_add(tgt.reshape(S * B, E), a.reshape(S * B, E),
                               p["ln2_g"], p["ln2_b"]).reshape(S, B, E)
    h1 = pallas_linear(tgt.reshape(S * B, E), p["w1"], p["b1"], activation="relu")
    h2 = pallas_linear(h1, p["w2"], p["b2"])
    tgt = pallas_layernorm_add(tgt.reshape(S * B, E), h2,
                               p["ln3_g"], p["ln3_b"]).reshape(S, B, E)
    return tgt


# ----------------------------------------------------------------------------
# Full forward (consumes prepared / pre-folded parameters)
# ----------------------------------------------------------------------------
def kirope_forward(p, images, belief_maps, positional_encoding, *,
                   num_joints, hidden_dim, nheads):
    # images: (B, 3, H, W) NCHW -> NHWC bf16 internally
    x = jnp.transpose(images, (0, 2, 3, 1)).astype(jnp.bfloat16)
    x = resnet50_forward(x, p["backbone"])                    # (B, h, w, 2048)
    B, fh, fw, _ = x.shape

    h = pallas_linear(x.reshape(B * fh * fw, 2048),
                      p["conv"]["w"], p["conv"]["b"])         # 1x1 conv
    h = h.reshape(B, fh * fw, hidden_dim).transpose(1, 0, 2)  # (S, B, E)

    src = h + jnp.transpose(positional_encoding, (1, 0, 2)).astype(jnp.float32)
    for lp in p["encoder"]:
        src = encoder_layer(src, lp, nheads=nheads)

    tgt = jnp.transpose(belief_maps, (1, 0, 2)).astype(jnp.float32)
    for lp in p["decoder"]:
        tgt = decoder_layer(tgt, src, lp, nheads=nheads)

    x = jnp.transpose(tgt, (1, 0, 2))                         # (B, J, E)
    Sd = x.shape[1]
    x = pallas_linear(x.reshape(B * Sd, hidden_dim),
                      p["fc_out"]["w"], p["fc_out"]["b"])
    x = x.reshape(-1, num_joints, 25, 25)
    x = jnp.transpose(x, (0, 2, 3, 1))                        # (B, 25, 25, J)

    u = p["up"]
    x = deconv_stride5_k5(x, u["w1"], u["b1"])                # (B,125,125,256)
    x = deconv_stride2_k4(x, u["w2"], u["b2"])                # (B,250,250,256)
    y = deconv_stride2_k4_head(x, u["w3"], u["b3"],
                               u["wf"], u["bf"])              # (B,500,500,J)
    return {"pred_belief_maps": jnp.transpose(y, (0, 3, 1, 2))}   # NCHW


# ----------------------------------------------------------------------------
# Deterministic (PyTorch-layout) parameter initialisation
# ----------------------------------------------------------------------------
class ParamGen:
    def __init__(self, seed):
        self._key = jax.random.PRNGKey(seed)

    def _next(self):
        self._key, k = jax.random.split(self._key)
        return k

    def normal(self, shape, scale):
        return (scale * jax.random.normal(self._next(), shape)).astype(jnp.float32)

    def conv(self, shape):   # (Cout, Cin, kh, kw), He init
        fan_in = shape[1] * shape[2] * shape[3]
        return self.normal(shape, math.sqrt(2.0 / fan_in))

    def linear_t(self, in_f, out_f):   # pre-transposed (K, N) matmul layout
        return self.normal((in_f, out_f), 1.0 / math.sqrt(in_f))


def init_bn(c):
    return dict(gamma=jnp.ones((c,), jnp.float32), beta=jnp.zeros((c,), jnp.float32),
                mean=jnp.zeros((c,), jnp.float32), var=jnp.ones((c,), jnp.float32))


def init_resnet50(pg):
    p = {"conv1": pg.conv((64, 3, 7, 7)), "bn1": init_bn(64)}

    def make_layer(in_c, width, blocks):
        layer = []
        for bi in range(blocks):
            cin = in_c if bi == 0 else width * 4
            blk = {"conv1": pg.conv((width, cin, 1, 1)), "bn1": init_bn(width),
                   "conv2": pg.conv((width, width, 3, 3)), "bn2": init_bn(width),
                   "conv3": pg.conv((width * 4, width, 1, 1)), "bn3": init_bn(width * 4)}
            if bi == 0:
                blk["down_conv"] = pg.conv((width * 4, in_c, 1, 1))
                blk["down_bn"] = init_bn(width * 4)
            layer.append(blk)
        return layer

    p["layer1"] = make_layer(64, 64, 3)
    p["layer2"] = make_layer(256, 128, 4)
    p["layer3"] = make_layer(512, 256, 6)
    p["layer4"] = make_layer(1024, 512, 3)
    return p


def init_params(seed, num_joints, hidden_dim, nheads,
                num_encoder_layers, num_decoder_layers, dim_feedforward=2048):
    pg = ParamGen(seed)
    E = hidden_dim
    params = {"backbone": init_resnet50(pg),
              "conv_w_mat": pg.linear_t(2048, E),
              "conv_b": jnp.zeros((E,), jnp.float32)}

    def mha():
        return dict(wq=pg.linear_t(E, E), bq=jnp.zeros((E,), jnp.float32),
                    wk=pg.linear_t(E, E), bk=jnp.zeros((E,), jnp.float32),
                    wv=pg.linear_t(E, E), bv=jnp.zeros((E,), jnp.float32),
                    wo=pg.linear_t(E, E), bo=jnp.zeros((E,), jnp.float32))

    def ffn_ln(n_ln):
        d = dict(w1=pg.linear_t(E, dim_feedforward),
                 b1=jnp.zeros((dim_feedforward,), jnp.float32),
                 w2=pg.linear_t(dim_feedforward, E),
                 b2=jnp.zeros((E,), jnp.float32))
        for i in range(1, n_ln + 1):
            d[f"ln{i}_g"] = jnp.ones((E,), jnp.float32)
            d[f"ln{i}_b"] = jnp.zeros((E,), jnp.float32)
        return d

    params["encoder"] = [dict(self_attn=mha(), **ffn_ln(2))
                         for _ in range(num_encoder_layers)]
    params["decoder"] = [dict(self_attn=mha(), cross_attn=mha(), **ffn_ln(3))
                         for _ in range(num_decoder_layers)]
    params["fc_out_w_mat"] = pg.linear_t(E, 25 * 25)
    params["fc_out_b"] = jnp.zeros((25 * 25,), jnp.float32)
    params["upsample"] = dict(
        w1=pg.normal((num_joints, 256, 5, 5), math.sqrt(2.0 / (num_joints * 25))),
        b1=jnp.zeros((256,), jnp.float32), bn1=init_bn(256),
        w2=pg.normal((256, 256, 4, 4), math.sqrt(2.0 / (256 * 16))),
        b2=jnp.zeros((256,), jnp.float32), bn2=init_bn(256),
        w3=pg.normal((256, 256, 4, 4), math.sqrt(2.0 / (256 * 16))),
        b3=jnp.zeros((256,), jnp.float32), bn3=init_bn(256),
        wf_mat=pg.linear_t(256, num_joints),      # 1x1 conv weight, (Cin, J)
        bf=jnp.zeros((num_joints,), jnp.float32))
    return params


# ----------------------------------------------------------------------------
# One-time weight preparation (BN folding, (K,N) layout, bf16, tap packing)
# ----------------------------------------------------------------------------
def _bn_scale_shift(bn, eps=1e-5):
    scale = bn["gamma"] / jnp.sqrt(bn["var"] + eps)
    return scale, bn["beta"] - bn["mean"] * scale


def _prep_conv(w, bn=None, bias=None):
    Cout = w.shape[0]
    Wm = jnp.transpose(w, (2, 3, 1, 0)).reshape(-1, Cout)     # K ordered (kh,kw,cin)
    b = jnp.zeros((Cout,), jnp.float32) if bias is None else bias
    if bn is not None:
        scale, shift = _bn_scale_shift(bn)
        Wm = Wm * scale[None, :]
        b = b * scale + shift
    return {"w": Wm.astype(jnp.bfloat16), "b": b.astype(jnp.float32)}


def _prep_linear(w, b):
    return {"w": w.astype(jnp.bfloat16), "b": b.astype(jnp.float32)}


def _prep_deconv5(w, bias, bn):
    Cin, Cout = w.shape[0], w.shape[1]
    scale, shift = _bn_scale_shift(bn)
    Wm = jnp.transpose(w, (0, 2, 3, 1)).reshape(Cin, 25 * Cout)   # cols (kh,kw,cout)
    Wm = Wm * jnp.tile(scale, 25)[None, :]
    b = jnp.tile(bias * scale + shift, 25)
    return {"w": Wm.astype(jnp.bfloat16), "b": b.astype(jnp.float32)}


def _prep_deconv4(w, bias, bn):
    """Pack ConvTranspose2d(k=4,s=2,p=1) weights per output phase (ry,rx)."""
    scale, shift = _bn_scale_shift(bn)
    phases = []
    for ry in range(2):
        for rx in range(2):
            taps = []
            for ty in range(2):
                for tx in range(2):
                    taps.append(w[:, :, 3 - ry - 2 * ty, 3 - rx - 2 * tx]
                                * scale[None, :])
            phases.append(jnp.concatenate(taps, axis=0))          # (4*Cin, Cout)
    return {"w": jnp.stack(phases, axis=0).astype(jnp.bfloat16),  # (4,4Cin,Cout)
            "b": (bias * scale + shift).astype(jnp.float32)}


def _prep_self_attn(m):
    return {"w_qkv": jnp.concatenate([m["wq"], m["wk"], m["wv"]], axis=1).astype(jnp.bfloat16),
            "b_qkv": jnp.concatenate([m["bq"], m["bk"], m["bv"]]).astype(jnp.float32),
            "wo": m["wo"].astype(jnp.bfloat16), "bo": m["bo"].astype(jnp.float32)}


def _prep_cross_attn(m):
    return {"wq": m["wq"].astype(jnp.bfloat16), "bq": m["bq"].astype(jnp.float32),
            "w_kv": jnp.concatenate([m["wk"], m["wv"]], axis=1).astype(jnp.bfloat16),
            "b_kv": jnp.concatenate([m["bk"], m["bv"]]).astype(jnp.float32),
            "wo": m["wo"].astype(jnp.bfloat16), "bo": m["bo"].astype(jnp.float32)}


def _prep_layer_common(lp, n_ln):
    d = {"w1": lp["w1"].astype(jnp.bfloat16), "b1": lp["b1"].astype(jnp.float32),
         "w2": lp["w2"].astype(jnp.bfloat16), "b2": lp["b2"].astype(jnp.float32)}
    for i in range(1, n_ln + 1):
        d[f"ln{i}_g"] = lp[f"ln{i}_g"].astype(jnp.float32)
        d[f"ln{i}_b"] = lp[f"ln{i}_b"].astype(jnp.float32)
    return d


def prepare_params(raw):
    bb = raw["backbone"]
    pb = {"stem": _prep_conv(bb["conv1"], bb["bn1"])}
    for name in ("layer1", "layer2", "layer3", "layer4"):
        blocks = []
        for blk in bb[name]:
            d = {"conv1": _prep_conv(blk["conv1"], blk["bn1"]),
                 "conv2": _prep_conv(blk["conv2"], blk["bn2"]),
                 "conv3": _prep_conv(blk["conv3"], blk["bn3"])}
            if "down_conv" in blk:
                d["down"] = _prep_conv(blk["down_conv"], blk["down_bn"])
            blocks.append(d)
        pb[name] = blocks

    enc = []
    for lp in raw["encoder"]:
        d = _prep_layer_common(lp, 2)
        d["self_attn"] = _prep_self_attn(lp["self_attn"])
        enc.append(d)
    dec = []
    for lp in raw["decoder"]:
        d = _prep_layer_common(lp, 3)
        d["self_attn"] = _prep_self_attn(lp["self_attn"])
        d["cross_attn"] = _prep_cross_attn(lp["cross_attn"])
        dec.append(d)

    u = raw["upsample"]
    d5 = _prep_deconv5(u["w1"], u["b1"], u["bn1"])
    d2 = _prep_deconv4(u["w2"], u["b2"], u["bn2"])
    d3 = _prep_deconv4(u["w3"], u["b3"], u["bn3"])
    up = {"w1": d5["w"], "b1": d5["b"],
          "w2": d2["w"], "b2": d2["b"],
          "w3": d3["w"], "b3": d3["b"],
          "wf": u["wf_mat"].astype(jnp.bfloat16),
          "bf": u["bf"].astype(jnp.float32)}

    return {"backbone": pb,
            "conv": _prep_linear(raw["conv_w_mat"], raw["conv_b"]),
            "encoder": enc, "decoder": dec,
            "fc_out": _prep_linear(raw["fc_out_w_mat"], raw["fc_out_b"]),
            "up": up}


# ----------------------------------------------------------------------------
if __name__ == "__main__":
    B = 2
    IMG = 64                       # backbone downsamples by 32 -> 2x2 feature map
    NUM_JOINTS = 7                 # required by the module (upsample in_channels=7)
    HIDDEN = 32
    NHEADS = 2
    NUM_ENC = 2                    # small stack (module default is 7)
    NUM_DEC = 2

    raw = init_params(seed=42, num_joints=NUM_JOINTS, hidden_dim=HIDDEN,
                      nheads=NHEADS, num_encoder_layers=NUM_ENC,
                      num_decoder_layers=NUM_DEC)
    params = prepare_params(raw)   # one-time: BN fold, layout, bf16, tap packing

    key = jax.random.PRNGKey(0)
    k1, k2, k3 = jax.random.split(key, 3)
    images = jax.random.normal(k1, (B, 3, IMG, IMG), jnp.float32)        # NCHW
    S_ENC = (IMG // 32) ** 2                                             # = 4
    positional_encoding = jax.random.normal(k2, (B, S_ENC, HIDDEN), jnp.float32)
    belief_maps = jax.random.normal(k3, (B, NUM_JOINTS, HIDDEN), jnp.float32)

    out = kirope_forward(params, images, belief_maps, positional_encoding,
                         num_joints=NUM_JOINTS, hidden_dim=HIDDEN, nheads=NHEADS)
    pred = out["pred_belief_maps"]
    jax.block_until_ready(pred)
    assert pred.shape == (B, NUM_JOINTS, 500, 500), pred.shape
    assert bool(jnp.all(jnp.isfinite(pred)))
    print("KERNEL_OK")
</pallas_src>

<mosaic_0001>
module attributes {stable_mosaic.version = 11 : i64} {
  func.func @_matmul_kernel_direct(%arg0: i32, %arg1: i32, %arg2: memref<512x147xbf16, #tpu.memory_space<vmem>>, %arg3: memref<147x64xbf16, #tpu.memory_space<vmem>>, %arg4: memref<1x64xf32, #tpu.memory_space<vmem>>, %arg5: memref<512x64xbf16, #tpu.memory_space<vmem>>) attributes {dimension_semantics = [#tpu.dimension_semantics<parallel>, #tpu.dimension_semantics<parallel>], iteration_bounds = array<i64: 4, 1>, scalar_prefetch = 0 : i64, scratch_operands = 0 : i64, tpu.core_type = #tpu.core_type<tc>, window_params = [{transform_indices = @transform_0, window_bounds = array<i64: 512, 147>}, {transform_indices = @transform_1, window_bounds = array<i64: 147, 64>}, {transform_indices = @transform_2, window_bounds = array<i64: 1, 64>}, {transform_indices = @transform_3, window_bounds = array<i64: 512, 64>}]} {
    %c0 = arith.constant 0 : index
    %c0_0 = arith.constant 0 : index
    %0 = vector.load %arg2[%c0, %c0_0] : memref<512x147xbf16, #tpu.memory_space<vmem>>, vector<512x147xbf16>
    %c0_1 = arith.constant 0 : index
    %c0_2 = arith.constant 0 : index
    %1 = vector.load %arg3[%c0_1, %c0_2] : memref<147x64xbf16, #tpu.memory_space<vmem>>, vector<147x64xbf16>
    %cst = arith.constant dense<0.000000e+00> : vector<512x64xf32>
    %2 = tpu.matmul %0, %1, %cst {dimension_numbers = #tpu.dot_dimension_numbers<[1], [0], [0], [1], [0, 0, 1, 1], [], []>} : vector<512x147xbf16>, vector<147x64xbf16>, vector<512x64xf32> -> vector<512x64xf32>
    %c0_3 = arith.constant 0 : index
    %c0_4 = arith.constant 0 : index
    %3 = vector.load %arg4[%c0_3, %c0_4] : memref<1x64xf32, #tpu.memory_space<vmem>>, vector<1x64xf32>
    %4 = vector.broadcast %3 : vector<1x64xf32> to vector<512x64xf32>
    %5 = arith.addf %2, %4 : vector<512x64xf32>
    %cst_5 = arith.constant 0.000000e+00 : f32
    %6 = vector.broadcast %cst_5 : f32 to vector<512x64xf32>
    %7 = arith.maximumf %5, %6 : vector<512x64xf32>
    %8 = arith.truncf %7 : vector<512x64xf32> to vector<512x64xbf16>
    %c0_6 = arith.constant 0 : index
    %c0_7 = arith.constant 0 : index
    %9 = vector.load %arg5[%c0_6, %c0_7] : memref<512x64xbf16, #tpu.memory_space<vmem>>, vector<512x64xbf16>
    tpu.vector_store %arg5[%c0_6, %c0_7], %8 {strides = array<i32>} : memref<512x64xbf16, #tpu.memory_space<vmem>>, vector<512x64xbf16>,
    return
  }
  func.func @transform_0(%arg0: i32, %arg1: i32) -> (i32, i32) {
    %c0_i32 = arith.constant 0 : i32
    %c0_i32_0 = arith.constant 0 : i32
    return %arg0, %c0_i32 : i32, i32
  }
  func.func @transform_1(%arg0: i32, %arg1: i32) -> (i32, i32) {
    %c0_i32 = arith.constant 0 : i32
    %c0_i32_0 = arith.constant 0 : i32
    return %c0_i32, %arg1 : i32, i32
  }
  func.func @transform_2(%arg0: i32, %arg1: i32) -> (i32, i32) {
    %c0_i32 = arith.constant 0 : i32
    %c0_i32_0 = arith.constant 0 : i32
    return %c0_i32, %arg1 : i32, i32
  }
  func.func @transform_3(%arg0: i32, %arg1: i32) -> (i32, i32) {
    %c0_i32 = arith.constant 0 : i32
    return %arg0, %arg1 : i32, i32
  }
}

</mosaic_0001>

<bundles_post_ra>
// kernel: pallas_linear.1
= control target key start
LH: loop header
LB: loop body
LE: loop exit
PB: predicated region body
PF: predicated region fallthrough
CT: control target
= control target key end

     0   :  { %s1992_s12 = smov 0   ;;  %s1994_s13 = smov 0   ;;  %s2356_s0 = inlined_call_operand.vmem [shape: bf16[2048,147], index: 0, kind: input, shape index: {}]   ;;  %s2357_s1 = inlined_call_operand.vmem [shape: bf16[147,64], index: 1, kind: input, shape index: {}]   ;;  %s2358_s2 = inlined_call_operand.vmem [shape: f32[1,64], index: 2, kind: input, shape index: {}]   ;;  %s2359_s3 = inlined_call_operand.vmem [shape: bf16[2048,64], index: 3, kind: output, shape index: {}]  }
   0x1   :  { %s1996_s14 = smov 0  }
   0x2 LB: > { %s25_s15 = sadd.s32 1, %s1964_s13  ;;  %p1550_p0 = scmp.ge.s32.totalorder %s1968_s14, 1  ;;  %s1968_s14 = sphi %s1996_s14, %s13_s14   ;;  %s1964_s13 = sphi %s1994_s13, %s2361_s13   ;;  %s1960_s12 = sphi %s1992_s12, %s2360_s12  }
   0x3   : > { %p27_p1 = scmp.ge.s32.totalorder %s25_s15, 4  ;;  %p170_p2 = scmp.lt.s32.totalorder %s1968_s14, 5 }
   0x5   : > { %s2363_s15 = smov (%p27_p1, %s25_s15), 0  ;;  %p171_p3 = pnand %p1550_p0, %p170_p2 }
   0x6   : > { %s1551_s22 = sshll.u32 (!%p171_p3), %s1960_s12, 6 }
   0x7   : > { %174 = sbr.rel (%p171_p3) target bundleno = 377 (0x179), region = 32  ;;  %p206_p4 = scmp.lt.s32.totalorder (!%p171_p3), %s1551_s22, 255 }
   0xc   : > { %v1840_v0 = vld [vmem:[%s2357_s1 + $0x38] sm:$0xff]   ;;  %v1970_v1 = vmov 0   ;;  %v1841_v2 = vld [vmem:[%s2357_s1 + $0x30] sm:$0xff]   ;;  %v1842_v3 = vld [vmem:[%s2357_s1 + $0x28] sm:$0xff]   ;;  %s2365_s22 = smov (!%p206_p4, %s1551_s22), 255  ;;  %vm664_vm0 = vcmask 154624  }
   0xd   : > { %768 = vmatprep.subr.bf16.mxu0 %v1970_v1  ;;  %1794 = vmatprep.subr.bf16.mxu1 %v1970_v1  ;;  %v1843_v4 = vld [vmem:[%s2357_s1 + $0x20] sm:$0xff]   ;;  %s1729_s25 = sshll.u32 %s2365_s22, 3  ;;  %v1844_v5 = vld [vmem:[%s2357_s1 + $0x18] sm:$0xff]   ;;  %v1845_v8 = vld [vmem:[%s2357_s1 + $0x10] sm:$0xff]   ;;  %vm761_vm1 = vcmask 1040384   ;;  %vm762_vm2 = vcmask 1041408  }
   0xe   : > { %769 = vmatpush1.bf16.msra.mxu0 %v1840_v0  ;;  %1804 = vmatpush1.bf16.msra.mxu1 %v1840_v0  ;;  %s2028_s28 = scalar_lea.vmem %s2356_s0, %s1729_s25  ;;  %v1846_v9 = vld [vmem:[%s2357_s1 + $0x8] sm:$0xff]   ;;  %v1971_v10 = vmov 65535   ;;  %v1847_v12 = vld [vmem:[%s2357_s1] sm:$0xff]   ;;  %s1555_s19 = sshll.u32 %s2365_s22, 2  ;;  %vm1377_vm3 = vcmask 519168  }
   0xf   : > { %770 = vmatprep.subr.bf16.mxu0 %v1970_v1  ;;  %1795 = vmatprep.subr.bf16.mxu1 %v1970_v1  ;;  %v1852_v6 = vld [vmem:[%s2028_s28 + $0x4] ss:$8 sps:$4 sm:$0xff]   ;;  %v763_v11 = vsel %vm761_vm1, 4294967295, %v1971_v10  ;;  %v1848_v13 = vld [vmem:[%s2357_s1 + $0x48] ss:$0 sps:$4 sm:$0x33]   ;;  %s2155_s23 = scalar_lea.vmem %s2359_s3, %s1555_s19 }
  0x10   : > { %v1855_v7 = vld [vmem:[%s2028_s28 + $0x104] ss:$8 sps:$4 sm:$0xff]   ;;  %1631 = vmatprep.mubr.msk.bf16.mxu0 %vm664_vm0, %v1852_v6  ;;  %v764_v14 = vsel %vm762_vm2, %v763_v11, 0  ;;  %v1850_v17 = vld [vmem:[%s2028_s28] ss:$8 sps:$4 sm:$0xff]  }
  0x11   : > { %1647 = vmatprep.mubr.msk.bf16.mxu1 %vm664_vm0, %v1855_v7  ;;  %v766_v15 = vand.u32 %v1848_v13, %v764_v14  ;;  %v1849_v16 = vld [vmem:[%s2357_s1 + $0x40] sm:$0xff]   ;;  %v1856_v19 = vld [vmem:[%s2028_s28 + $0x14] ss:$8 sps:$4 sm:$0xff]   ;;  %v1860_v21 = vld [vmem:[%s2028_s28 + $0x10] ss:$8 sps:$4 sm:$0xff]  }
  0x12   : > { %771 = vmatpush1.bf16.msra.mxu0 %v1841_v2  ;;  %1805 = vmatpush1.bf16.msra.mxu1 %v1841_v2  ;;  %v1853_v18 = vld [vmem:[%s2028_s28 + $0x100] ss:$8 sps:$4 sm:$0xff]   ;;  %v1858_v20 = vld [vmem:[%s2028_s28 + $0x114] ss:$8 sps:$4 sm:$0xff]   ;;  %v1861_v22 = vld [vmem:[%s2028_s28 + $0x110] ss:$8 sps:$4 sm:$0xff]  }
  0x13   : > { %772 = vmatprep.subr.bf16.mxu0 %v1970_v1  ;;  %1796 = vmatprep.subr.bf16.mxu1 %v1970_v1  ;;  %v1862_v23 = vld [vmem:[%s2028_s28 + $0x24] ss:$8 sps:$4 sm:$0xff]   ;;  %v1866_v25 = vld [vmem:[%s2028_s28 + $0x20] ss:$8 sps:$4 sm:$0xff]   ;;  %v1868_v27 = vld [vmem:[%s2028_s28 + $0x34] ss:$8 sps:$4 sm:$0xff]  }
  0x14   : > { %v1864_v24 = vld [vmem:[%s2028_s28 + $0x124] ss:$8 sps:$4 sm:$0xff]   ;;  %v1867_v26 = vld [vmem:[%s2028_s28 + $0x120] ss:$8 sps:$4 sm:$0xff]   ;;  %v1870_v28 = vld [vmem:[%s2028_s28 + $0x134] ss:$8 sps:$4 sm:$0xff]  }
  0x15   : > { %v1872_v29 = vld [vmem:[%s2028_s28 + $0x30] ss:$8 sps:$4 sm:$0xff]   ;;  %v1874_v31 = vld [vmem:[%s2028_s28 + $0x44] ss:$8 sps:$4 sm:$0xff]   ;;  %v1878_v33 = vld [vmem:[%s2028_s28 + $0x40] ss:$8 sps:$4 sm:$0xff]  }
  0x16   : > { %773 = vmatpush1.bf16.msra.mxu0 %v1842_v3  ;;  %1806 = vmatpush1.bf16.msra.mxu1 %v1842_v3  ;;  %v1873_v30 = vld [vmem:[%s2028_s28 + $0x130] ss:$8 sps:$4 sm:$0xff]   ;;  %v1876_v32 = vld [vmem:[%s2028_s28 + $0x144] ss:$8 sps:$4 sm:$0xff]   ;;  %v1879_v34 = vld [vmem:[%s2028_s28 + $0x140] ss:$8 sps:$4 sm:$0xff]  }
  0x17   : > { %774 = vmatprep.subr.bf16.mxu0 %v1970_v1  ;;  %1797 = vmatprep.subr.bf16.mxu1 %v1970_v1  ;;  %v1880_v35 = vld [vmem:[%s2028_s28 + $0x54] ss:$8 sps:$4 sm:$0xff]   ;;  %v1884_v37 = vld [vmem:[%s2028_s28 + $0x50] ss:$8 sps:$4 sm:$0xff]   ;;  %v1886_v39 = vld [vmem:[%s2028_s28 + $0x64] ss:$8 sps:$4 sm:$0xff]  }
  0x18   : > { %v1882_v36 = vld [vmem:[%s2028_s28 + $0x154] ss:$8 sps:$4 sm:$0xff]   ;;  %v1885_v38 = vld [vmem:[%s2028_s28 + $0x150] ss:$8 sps:$4 sm:$0xff]   ;;  %v1888_v40 = vld [vmem:[%s2028_s28 + $0x164] ss:$8 sps:$4 sm:$0xff]  }
  0x19   : > { %v1890_v41 = vld [vmem:[%s2028_s28 + $0x60] ss:$8 sps:$4 sm:$0xff]   ;;  %v1892_v43 = vld [vmem:[%s2028_s28 + $0x74] ss:$8 sps:$4 sm:$0xff]   ;;  %v1896_v45 = vld [vmem:[%s2028_s28 + $0x70] ss:$8 sps:$4 sm:$0xff]  }
  0x1a   : > { %775 = vmatpush1.bf16.msra.mxu0 %v1843_v4  ;;  %1807 = vmatpush1.bf16.msra.mxu1 %v1843_v4  ;;  %v1891_v42 = vld [vmem:[%s2028_s28 + $0x160] ss:$8 sps:$4 sm:$0xff]   ;;  %v1894_v44 = vld [vmem:[%s2028_s28 + $0x174] ss:$8 sps:$4 sm:$0xff]   ;;  %v1897_v46 = vld [vmem:[%s2028_s28 + $0x170] ss:$8 sps:$4 sm:$0xff]  }
  0x1b   : > { %776 = vmatprep.subr.bf16.mxu0 %v1970_v1  ;;  %1798 = vmatprep.subr.bf16.mxu1 %v1970_v1  ;;  %v1898_v47 = vld [vmem:[%s2028_s28 + $0x84] ss:$8 sps:$4 sm:$0xff]   ;;  %v1902_v49 = vld [vmem:[%s2028_s28 + $0x80] ss:$8 sps:$4 sm:$0xff]   ;;  %v1904_v51 = vld [vmem:[%s2028_s28 + $0x94] ss:$8 sps:$4 sm:$0xff]  }
  0x1c   : > { %v1900_v48 = vld [vmem:[%s2028_s28 + $0x184] ss:$8 sps:$4 sm:$0xff]   ;;  %v1903_v50 = vld [vmem:[%s2028_s28 + $0x180] ss:$8 sps:$4 sm:$0xff]   ;;  %v1906_v52 = vld [vmem:[%s2028_s28 + $0x194] ss:$8 sps:$4 sm:$0xff]  }
  0x1d   : > { %v1908_v53 = vld [vmem:[%s2028_s28 + $0x90] ss:$8 sps:$4 sm:$0xff]   ;;  %v1910_v55 = vld [vmem:[%s2028_s28 + $0xa4] ss:$8 sps:$4 sm:$0xff]   ;;  %v1914_v57 = vld [vmem:[%s2028_s28 + $0xa0] ss:$8 sps:$4 sm:$0xff]  }
  0x1e   : > { %777 = vmatpush1.bf16.msra.mxu0 %v1844_v5  ;;  %1808 = vmatpush1.bf16.msra.mxu1 %v1844_v5  ;;  %v1909_v54 = vld [vmem:[%s2028_s28 + $0x190] ss:$8 sps:$4 sm:$0xff]   ;;  %v1912_v56 = vld [vmem:[%s2028_s28 + $0x1a4] ss:$8 sps:$4 sm:$0xff]   ;;  %v1915_v58 = vld [vmem:[%s2028_s28 + $0x1a0] ss:$8 sps:$4 sm:$0xff]  }
  0x1f   : > { %778 = vmatprep.subr.bf16.mxu0 %v1970_v1  ;;  %1799 = vmatprep.subr.bf16.mxu1 %v1970_v1  ;;  %v1916_v59 = vld [vmem:[%s2028_s28 + $0xb4] ss:$8 sps:$4 sm:$0xff]   ;;  %v1920_v61 = vld [vmem:[%s2028_s28 + $0xb0] ss:$8 sps:$4 sm:$0xff]   ;;  %v1922_v63 = vld [vmem:[%s2028_s28 + $0xc4] ss:$8 sps:$4 sm:$0xff]  }
  0x20   : > { %v1918_v60 = vld [vmem:[%s2028_s28 + $0x1b4] ss:$8 sps:$4 sm:$0xff]   ;;  %v1921_v62 = vld [vmem:[%s2028_s28 + $0x1b0] ss:$8 sps:$4 sm:$0xff]   ;;  %v1924_v0 = vld [vmem:[%s2028_s28 + $0x1c4] ss:$8 sps:$4 sm:$0xff]  }
  0x21   : > { %v1927_v2 = vld [vmem:[%s2028_s28 + $0x1c0] ss:$8 sps:$4 sm:$0xff]   ;;  %v1928_v3 = vld [vmem:[%s2028_s28 + $0xd4] ss:$8 sps:$4 sm:$0xff]   ;;  %v1932_v5 = vld [vmem:[%s2028_s28 + $0xd0] ss:$8 sps:$4 sm:$0xff]  }
  0x22   : > { %779 = vmatpush1.bf16.msra.mxu0 %v1845_v8  ;;  %1809 = vmatpush1.bf16.msra.mxu1 %v1845_v8  ;;  %v1930_v4 = vld [vmem:[%s2028_s28 + $0x1d4] ss:$8 sps:$4 sm:$0xff]   ;;  %v1933_v6 = vld [vmem:[%s2028_s28 + $0x1d0] ss:$8 sps:$4 sm:$0xff]   ;;  %v1934_v7 = vld [vmem:[%s2028_s28 + $0xe4] ss:$8 sps:$4 sm:$0xff]  }
  0x23   : > { %780 = vmatprep.subr.bf16.mxu0 %v1970_v1  ;;  %1800 = vmatprep.subr.bf16.mxu1 %v1970_v1  ;;  %v1936_v8 = vld [vmem:[%s2028_s28 + $0x1e4] ss:$8 sps:$4 sm:$0xff]   ;;  %v1939_v10 = vld [vmem:[%s2028_s28 + $0x1e0] ss:$8 sps:$4 sm:$0xff]   ;;  %v1940_v11 = vld [vmem:[%s2028_s28 + $0xf4] ss:$8 sps:$4 sm:$0xff]  }
  0x24   : > { %v1944_v13 = vld [vmem:[%s2028_s28 + $0xf0] ss:$8 sps:$4 sm:$0xff]  }
  0x25   : > { %v1945_v14 = vld [vmem:[%s2028_s28 + $0x1f0] ss:$8 sps:$4 sm:$0xff]  }
  0x26   : > { %781 = vmatpush1.bf16.msra.mxu0 %v1846_v9  ;;  %1810 = vmatpush1.bf16.msra.mxu1 %v1846_v9  ;;  %v1938_v9 = vld [vmem:[%s2028_s28 + $0xe0] ss:$8 sps:$4 sm:$0xff]  }
  0x27   : > { %782 = vmatprep.subr.bf16.mxu0 %v1970_v1  ;;  %1801 = vmatprep.subr.bf16.mxu1 %v1970_v1 }
  0x2a   : > { %783 = vmatpush1.bf16.msra.mxu0 %v1847_v12  ;;  %1811 = vmatpush1.bf16.msra.mxu1 %v1847_v12  ;;  %v1942_v12 = vld [vmem:[%s2028_s28 + $0x1f4] ss:$8 sps:$4 sm:$0xff]  }
  0x2b   : > { %796 = vmatprep.subr.bf16.mxu0 %v1970_v1  ;;  %1802 = vmatprep.subr.bf16.mxu1 %v1970_v1 }
  0x2e   : > { %797 = vmatpush2.bf16.msra.mxu0 %v766_v15  ;;  %1812 = vmatpush2.bf16.msra.mxu1 %v766_v15  ;;  %v2147_v15 = vld [vmem:[%s2358_s2] ss:$0 sm:$0xff] }
  0x2f   : > { %798 = vmatprep.subr.bf16.mxu0 %v1970_v1  ;;  %1803 = vmatprep.subr.bf16.mxu1 %v1970_v1  ;;  %v1926_v1 = vld [vmem:[%s2028_s28 + $0xc0] ss:$8 sps:$4 sm:$0xff]  }
  0x32   : > { %799 = vmatpush2.bf16.msra.mxu0 %v1849_v16  ;;  %1813 = vmatpush2.bf16.msra.mxu1 %v1849_v16 }
  0x35   : > { %801 = vmatmul.mubr.bf16.vlgmr.msra.gmra.mxu0 %v1850_v17  ;;  %929 = vmatmul.mubr.bf16.vlgmr.msra.gmra.mxu1 %v1853_v18 }
  0x36   : > { %1632 = vmatprep.mubr.msk.bf16.mxu0 %vm664_vm0, %v1856_v19  ;;  %1648 = vmatprep.mubr.msk.bf16.mxu1 %vm664_vm0, %v1858_v20 }
  0x3d   : > { %809 = vmatmul.mubr.bf16.gmra.mxu0 %v1860_v21  ;;  %937 = vmatmul.mubr.bf16.gmra.mxu1 %v1861_v22 }
  0x3e   : > { %1633 = vmatprep.mubr.msk.bf16.mxu0 %vm664_vm0, %v1862_v23  ;;  %1649 = vmatprep.mubr.msk.bf16.mxu1 %vm664_vm0, %v1864_v24 }
  0x45   : > { %817 = vmatmul.mubr.bf16.gmra.mxu0 %v1866_v25  ;;  %945 = vmatmul.mubr.bf16.gmra.mxu1 %v1867_v26 }
  0x46   : > { %1634 = vmatprep.mubr.msk.bf16.mxu0 %vm664_vm0, %v1868_v27  ;;  %1650 = vmatprep.mubr.msk.bf16.mxu1 %vm664_vm0, %v1870_v28 }
  0x4d   : > { %825 = vmatmul.mubr.bf16.gmra.mxu0 %v1872_v29  ;;  %953 = vmatmul.mubr.bf16.gmra.mxu1 %v1873_v30 }
  0x4e   : > { %1635 = vmatprep.mubr.msk.bf16.mxu0 %vm664_vm0, %v1874_v31  ;;  %1651 = vmatprep.mubr.msk.bf16.mxu1 %vm664_vm0, %v1876_v32 }
  0x55   : > { %833 = vmatmul.mubr.bf16.gmra.mxu0 %v1878_v33  ;;  %961 = vmatmul.mubr.bf16.gmra.mxu1 %v1879_v34 }
  0x56   : > { %1636 = vmatprep.mubr.msk.bf16.mxu0 %vm664_vm0, %v1880_v35  ;;  %1652 = vmatprep.mubr.msk.bf16.mxu1 %vm664_vm0, %v1882_v36 }
  0x5d   : > { %841 = vmatmul.mubr.bf16.gmra.mxu0 %v1884_v37  ;;  %969 = vmatmul.mubr.bf16.gmra.mxu1 %v1885_v38 }
  0x5e   : > { %1637 = vmatprep.mubr.msk.bf16.mxu0 %vm664_vm0, %v1886_v39  ;;  %1653 = vmatprep.mubr.msk.bf16.mxu1 %vm664_vm0, %v1888_v40 }
  0x65   : > { %849 = vmatmul.mubr.bf16.gmra.mxu0 %v1890_v41  ;;  %977 = vmatmul.mubr.bf16.gmra.mxu1 %v1891_v42 }
  0x66   : > { %1638 = vmatprep.mubr.msk.bf16.mxu0 %vm664_vm0, %v1892_v43  ;;  %1654 = vmatprep.mubr.msk.bf16.mxu1 %vm664_vm0, %v1894_v44 }
  0x6d   : > { %857 = vmatmul.mubr.bf16.gmra.mxu0 %v1896_v45  ;;  %985 = vmatmul.mubr.bf16.gmra.mxu1 %v1897_v46 }
  0x6e   : > { %1639 = vmatprep.mubr.msk.bf16.mxu0 %vm664_vm0, %v1898_v47  ;;  %1655 = vmatprep.mubr.msk.bf16.mxu1 %vm664_vm0, %v1900_v48 }
  0x75   : > { %865 = vmatmul.mubr.bf16.gmra.mxu0 %v1902_v49  ;;  %993 = vmatmul.mubr.bf16.gmra.mxu1 %v1903_v50 }
  0x76   : > { %1640 = vmatprep.mubr.msk.bf16.mxu0 %vm664_vm0, %v1904_v51  ;;  %1656 = vmatprep.mubr.msk.bf16.mxu1 %vm664_vm0, %v1906_v52 }
  0x7d   : > { %873 = vmatmul.mubr.bf16.gmra.mxu0 %v1908_v53  ;;  %1001 = vmatmul.mubr.bf16.gmra.mxu1 %v1909_v54 }
  0x7e   : > { %1641 = vmatprep.mubr.msk.bf16.mxu0 %vm664_vm0, %v1910_v55  ;;  %1657 = vmatprep.mubr.msk.bf16.mxu1 %vm664_vm0, %v1912_v56 }
  0x85   : > { %881 = vmatmul.mubr.bf16.gmra.mxu0 %v1914_v57  ;;  %1009 = vmatmul.mubr.bf16.gmra.mxu1 %v1915_v58 }
  0x86   : > { %1642 = vmatprep.mubr.msk.bf16.mxu0 %vm664_vm0, %v1916_v59  ;;  %1658 = vmatprep.mubr.msk.bf16.mxu1 %vm664_vm0, %v1918_v60 }
  0x8d   : > { %889 = vmatmul.mubr.bf16.gmra.mxu0 %v1920_v61  ;;  %1017 = vmatmul.mubr.bf16.gmra.mxu1 %v1921_v62 }
  0x8e   : > { %1643 = vmatprep.mubr.msk.bf16.mxu0 %vm664_vm0, %v1922_v63  ;;  %1659 = vmatprep.mubr.msk.bf16.mxu1 %vm664_vm0, %v1924_v0 }
  0x95   : > { %897 = vmatmul.mubr.bf16.gmra.mxu0 %v1926_v1  ;;  %1025 = vmatmul.mubr.bf16.gmra.mxu1 %v1927_v2 }
  0x96   : > { %1644 = vmatprep.mubr.msk.bf16.mxu0 %vm664_vm0, %v1928_v3  ;;  %1660 = vmatprep.mubr.msk.bf16.mxu1 %vm664_vm0, %v1930_v4 }
  0x9d   : > { %905 = vmatmul.mubr.bf16.gmra.mxu0 %v1932_v5  ;;  %1033 = vmatmul.mubr.bf16.gmra.mxu1 %v1933_v6 }
  0x9e   : > { %1645 = vmatprep.mubr.msk.bf16.mxu0 %vm664_vm0, %v1934_v7  ;;  %1661 = vmatprep.mubr.msk.bf16.mxu1 %vm664_vm0, %v1936_v8 }
  0xa5   : > { %913 = vmatmul.mubr.bf16.gmra.mxu0 %v1938_v9  ;;  %1041 = vmatmul.mubr.bf16.gmra.mxu1 %v1939_v10 }
  0xa6   : > { %1646 = vmatprep.mubr.msk.bf16.mxu0 %vm664_vm0, %v1940_v11  ;;  %1662 = vmatprep.mubr.msk.bf16.mxu1 %vm664_vm0, %v1942_v12 }
  0xad   : > { %921 = vmatmul.mubr.bf16.gmra.mxu0 %v1944_v13  ;;  %1049 = vmatmul.mubr.bf16.gmra.mxu1 %v1945_v14 }
  0xf5   : > { %v802_v16 = vpop.f32.mrf.mxu0  ;;  %v930_v17 = vpop.f32.mrf.mxu1 }
  0xf6   : > { %v803_v18 = vadd.f32 %v2147_v15, %v802_v16  ;;  %v931_v19 = vadd.f32 %v2147_v15, %v930_v17 }
  0xf7   : > { %v804_v20 = vpop.f32.mrf.mxu0  ;;  %v932_v21 = vpop.f32.mrf.mxu1 }
  0xf8   : > { %v1057_v22 = vmax.f32 %v803_v18, 0.0  ;;  %v1089_v23 = vmax.f32 %v931_v19, 0.0 }
  0xf9   : > { %v805_v24 = vpop.f32.mrf.mxu0  ;;  %v933_v25 = vpop.f32.mrf.mxu1 }
  0xfa   : > { %v1730_v26 = vpack.c.bf16 %v1057_v22, %v1057_v22  ;;  %v1762_v27 = vpack.c.bf16 %v1089_v23, %v1089_v23  ;;  %v806_v28 = vadd.f32 %v2147_v15, %v805_v24  ;;  %v934_v29 = vadd.f32 %v2147_v15, %v933_v25 }
  0xfb   : > { %v807_v30 = vpop.f32.mrf.mxu0  ;;  %v935_v31 = vpop.f32.mrf.mxu1 }
  0xfc   : > { %1378 = vst.msk [vmem:[%s2155_s23] sm:$0xf] %vm1377_vm3, %v1730_v26  ;;  %1410 = vst.msk [vmem:[%s2155_s23 + $0x80] sm:$0xf] %vm1377_vm3, %v1762_v27  ;;  %v1058_v32 = vmax.f32 %v806_v28, 0.0  ;;  %v1090_v33 = vmax.f32 %v934_v29, 0.0 }
  0xfd   : > { %v810_v34 = vpop.f32.mrf.mxu0  ;;  %v938_v35 = vpop.f32.mrf.mxu1 }
  0xfe   : > { %v1731_v36 = vpack.c.bf16 %v1058_v32, %v1058_v32  ;;  %v1763_v37 = vpack.c.bf16 %v1090_v33, %v1090_v33  ;;  %v811_v38 = vadd.f32 %v2147_v15, %v810_v34  ;;  %v939_v39 = vadd.f32 %v2147_v15, %v938_v35 }
  0xff   : > { %v812_v40 = vpop.f32.mrf.mxu0  ;;  %v940_v41 = vpop.f32.mrf.mxu1 }
 0x100   : > { %1379 = vst.msk [vmem:[%s2155_s23 + $0x4] sm:$0xf] %vm1377_vm3, %v1731_v36  ;;  %1411 = vst.msk [vmem:[%s2155_s23 + $0x84] sm:$0xf] %vm1377_vm3, %v1763_v37  ;;  %v1059_v42 = vmax.f32 %v811_v38, 0.0  ;;  %v1091_v43 = vmax.f32 %v939_v39, 0.0 }
 0x101   : > { %v813_v44 = vpop.f32.mrf.mxu0  ;;  %v941_v45 = vpop.f32.mrf.mxu1 }
 0x102   : > { %v1732_v46 = vpack.c.bf16 %v1059_v42, %v1059_v42  ;;  %v1764_v47 = vpack.c.bf16 %v1091_v43, %v1091_v43  ;;  %v814_v48 = vadd.f32 %v2147_v15, %v813_v44  ;;  %v942_v49 = vadd.f32 %v2147_v15, %v941_v45 }
 0x103   : > { %v815_v50 = vpop.f32.mrf.mxu0  ;;  %v943_v51 = vpop.f32.mrf.mxu1 }
 0x104   : > { %1380 = vst.msk [vmem:[%s2155_s23 + $0x8] sm:$0xf] %vm1377_vm3, %v1732_v46  ;;  %1412 = vst.msk [vmem:[%s2155_s23 + $0x88] sm:$0xf] %vm1377_vm3, %v1764_v47  ;;  %v1060_v52 = vmax.f32 %v814_v48, 0.0  ;;  %v1092_v53 = vmax.f32 %v942_v49, 0.0 }
 0x105   : > { %v818_v54 = vpop.f32.mrf.mxu0  ;;  %v946_v55 = vpop.f32.mrf.mxu1 }
 0x106   : > { %v1733_v56 = vpack.c.bf16 %v1060_v52, %v1060_v52  ;;  %v1765_v57 = vpack.c.bf16 %v1092_v53, %v1092_v53  ;;  %v819_v58 = vadd.f32 %v2147_v15, %v818_v54  ;;  %v947_v59 = vadd.f32 %v2147_v15, %v946_v55 }
 0x107   : > { %v820_v60 = vpop.f32.mrf.mxu0  ;;  %v948_v61 = vpop.f32.mrf.mxu1 }
 0x108   : > { %1381 = vst.msk [vmem:[%s2155_s23 + $0xc] sm:$0xf] %vm1377_vm3, %v1733_v56  ;;  %1413 = vst.msk [vmem:[%s2155_s23 + $0x8c] sm:$0xf] %vm1377_vm3, %v1765_v57  ;;  %v1061_v62 = vmax.f32 %v819_v58, 0.0  ;;  %v1093_v63 = vmax.f32 %v947_v59, 0.0 }
 0x109   : > { %v821_v0 = vpop.f32.mrf.mxu0  ;;  %v949_v1 = vpop.f32.mrf.mxu1 }
 0x10a   : > { %v1734_v2 = vpack.c.bf16 %v1061_v62, %v1061_v62  ;;  %v1766_v3 = vpack.c.bf16 %v1093_v63, %v1093_v63  ;;  %v822_v4 = vadd.f32 %v2147_v15, %v821_v0  ;;  %v950_v5 = vadd.f32 %v2147_v15, %v949_v1 }
 0x10b   : > { %v823_v6 = vpop.f32.mrf.mxu0  ;;  %v951_v7 = vpop.f32.mrf.mxu1 }
 0x10c   : > { %1382 = vst.msk [vmem:[%s2155_s23 + $0x10] sm:$0xf] %vm1377_vm3, %v1734_v2  ;;  %1414 = vst.msk [vmem:[%s2155_s23 + $0x90] sm:$0xf] %vm1377_vm3, %v1766_v3  ;;  %v1062_v8 = vmax.f32 %v822_v4, 0.0  ;;  %v1094_v9 = vmax.f32 %v950_v5, 0.0 }
 0x10d   : > { %v826_v10 = vpop.f32.mrf.mxu0  ;;  %v954_v11 = vpop.f32.mrf.mxu1 }
 0x10e   : > { %v1735_v12 = vpack.c.bf16 %v1062_v8, %v1062_v8  ;;  %v1767_v13 = vpack.c.bf16 %v1094_v9, %v1094_v9  ;;  %v827_v14 = vadd.f32 %v2147_v15, %v826_v10  ;;  %v955_v16 = vadd.f32 %v2147_v15, %v954_v11 }
 0x10f   : > { %v828_v17 = vpop.f32.mrf.mxu0  ;;  %v956_v18 = vpop.f32.mrf.mxu1 }
 0x110   : > { %1383 = vst.msk [vmem:[%s2155_s23 + $0x14] sm:$0xf] %vm1377_vm3, %v1735_v12  ;;  %1415 = vst.msk [vmem:[%s2155_s23 + $0x94] sm:$0xf] %vm1377_vm3, %v1767_v13  ;;  %v1063_v19 = vmax.f32 %v827_v14, 0.0  ;;  %v1095_v20 = vmax.f32 %v955_v16, 0.0 }
 0x111   : > { %v829_v21 = vpop.f32.mrf.mxu0  ;;  %v957_v22 = vpop.f32.mrf.mxu1 }
 0x112   : > { %v1736_v23 = vpack.c.bf16 %v1063_v19, %v1063_v19  ;;  %v1768_v24 = vpack.c.bf16 %v1095_v20, %v1095_v20  ;;  %v830_v25 = vadd.f32 %v2147_v15, %v829_v21  ;;  %v958_v26 = vadd.f32 %v2147_v15, %v957_v22 }
 0x113   : > { %v831_v27 = vpop.f32.mrf.mxu0  ;;  %v959_v28 = vpop.f32.mrf.mxu1 }
 0x114   : > { %1384 = vst.msk [vmem:[%s2155_s23 + $0x18] sm:$0xf] %vm1377_vm3, %v1736_v23  ;;  %1416 = vst.msk [vmem:[%s2155_s23 + $0x98] sm:$0xf] %vm1377_vm3, %v1768_v24  ;;  %v1064_v29 = vmax.f32 %v830_v25, 0.0  ;;  %v1096_v30 = vmax.f32 %v958_v26, 0.0 }
 0x115   : > { %v834_v31 = vpop.f32.mrf.mxu0  ;;  %v962_v32 = vpop.f32.mrf.mxu1 }
 0x116   : > { %v1737_v33 = vpack.c.bf16 %v1064_v29, %v1064_v29  ;;  %v1769_v34 = vpack.c.bf16 %v1096_v30, %v1096_v30  ;;  %v835_v35 = vadd.f32 %v2147_v15, %v834_v31  ;;  %v963_v36 = vadd.f32 %v2147_v15, %v962_v32 }
 0x117   : > { %v836_v37 = vpop.f32.mrf.mxu0  ;;  %v964_v38 = vpop.f32.mrf.mxu1 }
 0x118   : > { %1385 = vst.msk [vmem:[%s2155_s23 + $0x1c] sm:$0xf] %vm1377_vm3, %v1737_v33  ;;  %1417 = vst.msk [vmem:[%s2155_s23 + $0x9c] sm:$0xf] %vm1377_vm3, %v1769_v34  ;;  %v1065_v39 = vmax.f32 %v835_v35, 0.0  ;;  %v1097_v40 = vmax.f32 %v963_v36, 0.0 }
 0x119   : > { %v837_v41 = vpop.f32.mrf.mxu0  ;;  %v965_v42 = vpop.f32.mrf.mxu1 }
 0x11a   : > { %v1738_v43 = vpack.c.bf16 %v1065_v39, %v1065_v39  ;;  %v1770_v44 = vpack.c.bf16 %v1097_v40, %v1097_v40  ;;  %v838_v45 = vadd.f32 %v2147_v15, %v837_v41  ;;  %v966_v46 = vadd.f32 %v2147_v15, %v965_v42 }
 0x11b   : > { %v839_v47 = vpop.f32.mrf.mxu0  ;;  %v967_v48 = vpop.f32.mrf.mxu1 }
 0x11c   : > { %1386 = vst.msk [vmem:[%s2155_s23 + $0x20] sm:$0xf] %vm1377_vm3, %v1738_v43  ;;  %1418 = vst.msk [vmem:[%s2155_s23 + $0xa0] sm:$0xf] %vm1377_vm3, %v1770_v44  ;;  %v1066_v49 = vmax.f32 %v838_v45, 0.0  ;;  %v1098_v50 = vmax.f32 %v966_v46, 0.0 }
 0x11d   : > { %v842_v51 = vpop.f32.mrf.mxu0  ;;  %v970_v52 = vpop.f32.mrf.mxu1 }
 0x11e   : > { %v1739_v53 = vpack.c.bf16 %v1066_v49, %v1066_v49  ;;  %v1771_v54 = vpack.c.bf16 %v1098_v50, %v1098_v50  ;;  %v843_v55 = vadd.f32 %v2147_v15, %v842_v51  ;;  %v971_v56 = vadd.f32 %v2147_v15, %v970_v52 }
 0x11f   : > { %v844_v57 = vpop.f32.mrf.mxu0  ;;  %v972_v58 = vpop.f32.mrf.mxu1 }
 0x120   : > { %1387 = vst.msk [vmem:[%s2155_s23 + $0x24] sm:$0xf] %vm1377_vm3, %v1739_v53  ;;  %1419 = vst.msk [vmem:[%s2155_s23 + $0xa4] sm:$0xf] %vm1377_vm3, %v1771_v54  ;;  %v1067_v59 = vmax.f32 %v843_v55, 0.0  ;;  %v1099_v60 = vmax.f32 %v971_v56, 0.0 }
 0x121   : > { %v845_v61 = vpop.f32.mrf.mxu0  ;;  %v973_v62 = vpop.f32.mrf.mxu1 }
 0x122   : > { %v1740_v63 = vpack.c.bf16 %v1067_v59, %v1067_v59  ;;  %v1772_v0 = vpack.c.bf16 %v1099_v60, %v1099_v60  ;;  %v846_v1 = vadd.f32 %v2147_v15, %v845_v61  ;;  %v974_v2 = vadd.f32 %v2147_v15, %v973_v62 }
 0x123   : > { %v847_v3 = vpop.f32.mrf.mxu0  ;;  %v975_v4 = vpop.f32.mrf.mxu1 }
 0x124   : > { %1388 = vst.msk [vmem:[%s2155_s23 + $0x28] sm:$0xf] %vm1377_vm3, %v1740_v63  ;;  %1420 = vst.msk [vmem:[%s2155_s23 + $0xa8] sm:$0xf] %vm1377_vm3, %v1772_v0  ;;  %v1068_v5 = vmax.f32 %v846_v1, 0.0  ;;  %v1100_v6 = vmax.f32 %v974_v2, 0.0 }
 0x125   : > { %v850_v7 = vpop.f32.mrf.mxu0  ;;  %v978_v8 = vpop.f32.mrf.mxu1 }
 0x126   : > { %v1741_v9 = vpack.c.bf16 %v1068_v5, %v1068_v5  ;;  %v1773_v10 = vpack.c.bf16 %v1100_v6, %v1100_v6  ;;  %v851_v11 = vadd.f32 %v2147_v15, %v850_v7  ;;  %v979_v12 = vadd.f32 %v2147_v15, %v978_v8 }
 0x127   : > { %v852_v13 = vpop.f32.mrf.mxu0  ;;  %v980_v14 = vpop.f32.mrf.mxu1 }
 0x128   : > { %1389 = vst.msk [vmem:[%s2155_s23 + $0x2c] sm:$0xf] %vm1377_vm3, %v1741_v9  ;;  %1421 = vst.msk [vmem:[%s2155_s23 + $0xac] sm:$0xf] %vm1377_vm3, %v1773_v10  ;;  %v1069_v16 = vmax.f32 %v851_v11, 0.0  ;;  %v1101_v17 = vmax.f32 %v979_v12, 0.0 }
 0x129   : > { %v853_v18 = vpop.f32.mrf.mxu0  ;;  %v981_v19 = vpop.f32.mrf.mxu1 }
 0x12a   : > { %v1742_v20 = vpack.c.bf16 %v1069_v16, %v1069_v16  ;;  %v1774_v21 = vpack.c.bf16 %v1101_v17, %v1101_v17  ;;  %v854_v22 = vadd.f32 %v2147_v15, %v853_v18  ;;  %v982_v23 = vadd.f32 %v2147_v15, %v981_v19 }
 0x12b   : > { %v855_v24 = vpop.f32.mrf.mxu0  ;;  %v983_v25 = vpop.f32.mrf.mxu1 }
 0x12c   : > { %1390 = vst.msk [vmem:[%s2155_s23 + $0x30] sm:$0xf] %vm1377_vm3, %v1742_v20  ;;  %1422 = vst.msk [vmem:[%s2155_s23 + $0xb0] sm:$0xf] %vm1377_vm3, %v1774_v21  ;;  %v1070_v26 = vmax.f32 %v854_v22, 0.0  ;;  %v1102_v27 = vmax.f32 %v982_v23, 0.0 }
 0x12d   : > { %v858_v28 = vpop.f32.mrf.mxu0  ;;  %v986_v29 = vpop.f32.mrf.mxu1 }
 0x12e   : > { %v1743_v30 = vpack.c.bf16 %v1070_v26, %v1070_v26  ;;  %v1775_v31 = vpack.c.bf16 %v1102_v27, %v1102_v27  ;;  %v859_v32 = vadd.f32 %v2147_v15, %v858_v28  ;;  %v987_v33 = vadd.f32 %v2147_v15, %v986_v29 }
 0x12f   : > { %v860_v34 = vpop.f32.mrf.mxu0  ;;  %v988_v35 = vpop.f32.mrf.mxu1 }
 0x130   : > { %1391 = vst.msk [vmem:[%s2155_s23 + $0x34] sm:$0xf] %vm1377_vm3, %v1743_v30  ;;  %1423 = vst.msk [vmem:[%s2155_s23 + $0xb4] sm:$0xf] %vm1377_vm3, %v1775_v31  ;;  %v1071_v36 = vmax.f32 %v859_v32, 0.0  ;;  %v1103_v37 = vmax.f32 %v987_v33, 0.0 }
 0x131   : > { %v861_v38 = vpop.f32.mrf.mxu0  ;;  %v989_v39 = vpop.f32.mrf.mxu1 }
 0x132   : > { %v1744_v40 = vpack.c.bf16 %v1071_v36, %v1071_v36  ;;  %v1776_v41 = vpack.c.bf16 %v1103_v37, %v1103_v37  ;;  %v862_v42 = vadd.f32 %v2147_v15, %v861_v38  ;;  %v990_v43 = vadd.f32 %v2147_v15, %v989_v39 }
 0x133   : > { %v863_v44 = vpop.f32.mrf.mxu0  ;;  %v991_v45 = vpop.f32.mrf.mxu1 }
 0x134   : > { %1392 = vst.msk [vmem:[%s2155_s23 + $0x38] sm:$0xf] %vm1377_vm3, %v1744_v40  ;;  %1424 = vst.msk [vmem:[%s2155_s23 + $0xb8] sm:$0xf] %vm1377_vm3, %v1776_v41  ;;  %v1072_v46 = vmax.f32 %v862_v42, 0.0  ;;  %v1104_v47 = vmax.f32 %v990_v43, 0.0 }
 0x135   : > { %v866_v48 = vpop.f32.mrf.mxu0  ;;  %v994_v49 = vpop.f32.mrf.mxu1 }
 0x136   : > { %v1745_v50 = vpack.c.bf16 %v1072_v46, %v1072_v46  ;;  %v1777_v51 = vpack.c.bf16 %v1104_v47, %v1104_v47  ;;  %v867_v52 = vadd.f32 %v2147_v15, %v866_v48  ;;  %v995_v53 = vadd.f32 %v2147_v15, %v994_v49 }
 0x137   : > { %v868_v54 = vpop.f32.mrf.mxu0  ;;  %v996_v55 = vpop.f32.mrf.mxu1 }
 0x138   : > { %1393 = vst.msk [vmem:[%s2155_s23 + $0x3c] sm:$0xf] %vm1377_vm3, %v1745_v50  ;;  %1425 = vst.msk [vmem:[%s2155_s23 + $0xbc] sm:$0xf] %vm1377_vm3, %v1777_v51  ;;  %v1073_v56 = vmax.f32 %v867_v52, 0.0  ;;  %v1105_v57 = vmax.f32 %v995_v53, 0.0 }
 0x139   : > { %v869_v58 = vpop.f32.mrf.mxu0  ;;  %v997_v59 = vpop.f32.mrf.mxu1 }
 0x13a   : > { %v1746_v60 = vpack.c.bf16 %v1073_v56, %v1073_v56  ;;  %v1778_v61 = vpack.c.bf16 %v1105_v57, %v1105_v57  ;;  %v870_v62 = vadd.f32 %v2147_v15, %v869_v58  ;;  %v998_v63 = vadd.f32 %v2147_v15, %v997_v59 }
 0x13b   : > { %v871_v0 = vpop.f32.mrf.mxu0  ;;  %v999_v1 = vpop.f32.mrf.mxu1 }
 0x13c   : > { %1394 = vst.msk [vmem:[%s2155_s23 + $0x40] sm:$0xf] %vm1377_vm3, %v1746_v60  ;;  %1426 = vst.msk [vmem:[%s2155_s23 + $0xc0] sm:$0xf] %vm1377_vm3, %v1778_v61  ;;  %v1074_v2 = vmax.f32 %v870_v62, 0.0  ;;  %v1106_v3 = vmax.f32 %v998_v63, 0.0 }
 0x13d   : > { %v874_v4 = vpop.f32.mrf.mxu0  ;;  %v1002_v5 = vpop.f32.mrf.mxu1 }
 0x13e   : > { %v1747_v6 = vpack.c.bf16 %v1074_v2, %v1074_v2  ;;  %v1779_v7 = vpack.c.bf16 %v1106_v3, %v1106_v3  ;;  %v875_v8 = vadd.f32 %v2147_v15, %v874_v4  ;;  %v1003_v9 = vadd.f32 %v2147_v15, %v1002_v5 }
 0x13f   : > { %v876_v10 = vpop.f32.mrf.mxu0  ;;  %v1004_v11 = vpop.f32.mrf.mxu1 }
 0x140   : > { %1395 = vst.msk [vmem:[%s2155_s23 + $0x44] sm:$0xf] %vm1377_vm3, %v1747_v6  ;;  %1427 = vst.msk [vmem:[%s2155_s23 + $0xc4] sm:$0xf] %vm1377_vm3, %v1779_v7  ;;  %v1075_v12 = vmax.f32 %v875_v8, 0.0  ;;  %v1107_v13 = vmax.f32 %v1003_v9, 0.0 }
 0x141   : > { %v877_v14 = vpop.f32.mrf.mxu0  ;;  %v1005_v16 = vpop.f32.mrf.mxu1 }
 0x142   : > { %v1748_v17 = vpack.c.bf16 %v1075_v12, %v1075_v12  ;;  %v1780_v18 = vpack.c.bf16 %v1107_v13, %v1107_v13  ;;  %v878_v19 = vadd.f32 %v2147_v15, %v877_v14  ;;  %v1006_v20 = vadd.f32 %v2147_v15, %v1005_v16 }
 0x143   : > { %v879_v21 = vpop.f32.mrf.mxu0  ;;  %v1007_v22 = vpop.f32.mrf.mxu1 }
 0x144   : > { %1396 = vst.msk [vmem:[%s2155_s23 + $0x48] sm:$0xf] %vm1377_vm3, %v1748_v17  ;;  %1428 = vst.msk [vmem:[%s2155_s23 + $0xc8] sm:$0xf] %vm1377_vm3, %v1780_v18  ;;  %v1076_v23 = vmax.f32 %v878_v19, 0.0  ;;  %v1108_v24 = vmax.f32 %v1006_v20, 0.0 }
 0x145   : > { %v882_v25 = vpop.f32.mrf.mxu0  ;;  %v1010_v26 = vpop.f32.mrf.mxu1 }
 0x146   : > { %v1749_v27 = vpack.c.bf16 %v1076_v23, %v1076_v23  ;;  %v1781_v28 = vpack.c.bf16 %v1108_v24, %v1108_v24  ;;  %v883_v29 = vadd.f32 %v2147_v15, %v882_v25  ;;  %v1011_v30 = vadd.f32 %v2147_v15, %v1010_v26 }
 0x147   : > { %v884_v31 = vpop.f32.mrf.mxu0  ;;  %v1012_v32 = vpop.f32.mrf.mxu1 }
 0x148   : > { %1397 = vst.msk [vmem:[%s2155_s23 + $0x4c] sm:$0xf] %vm1377_vm3, %v1749_v27  ;;  %1429 = vst.msk [vmem:[%s2155_s23 + $0xcc] sm:$0xf] %vm1377_vm3, %v1781_v28  ;;  %v1077_v33 = vmax.f32 %v883_v29, 0.0  ;;  %v1109_v34 = vmax.f32 %v1011_v30, 0.0 }
 0x149   : > { %v885_v35 = vpop.f32.mrf.mxu0  ;;  %v1013_v36 = vpop.f32.mrf.mxu1 }
 0x14a   : > { %v1750_v37 = vpack.c.bf16 %v1077_v33, %v1077_v33  ;;  %v1782_v38 = vpack.c.bf16 %v1109_v34, %v1109_v34  ;;  %v886_v39 = vadd.f32 %v2147_v15, %v885_v35  ;;  %v1014_v40 = vadd.f32 %v2147_v15, %v1013_v36 }
 0x14b   : > { %v887_v41 = vpop.f32.mrf.mxu0  ;;  %v1015_v42 = vpop.f32.mrf.mxu1 }
 0x14c   : > { %1398 = vst.msk [vmem:[%s2155_s23 + $0x50] sm:$0xf] %vm1377_vm3, %v1750_v37  ;;  %1430 = vst.msk [vmem:[%s2155_s23 + $0xd0] sm:$0xf] %vm1377_vm3, %v1782_v38  ;;  %v1078_v43 = vmax.f32 %v886_v39, 0.0  ;;  %v1110_v44 = vmax.f32 %v1014_v40, 0.0 }
 0x14d   : > { %v890_v45 = vpop.f32.mrf.mxu0  ;;  %v1018_v46 = vpop.f32.mrf.mxu1 }
 0x14e   : > { %v1751_v47 = vpack.c.bf16 %v1078_v43, %v1078_v43  ;;  %v1783_v48 = vpack.c.bf16 %v1110_v44, %v1110_v44  ;;  %v891_v49 = vadd.f32 %v2147_v15, %v890_v45  ;;  %v1019_v50 = vadd.f32 %v2147_v15, %v1018_v46 }
 0x14f   : > { %v892_v51 = vpop.f32.mrf.mxu0  ;;  %v1020_v52 = vpop.f32.mrf.mxu1 }
 0x150   : > { %1399 = vst.msk [vmem:[%s2155_s23 + $0x54] sm:$0xf] %vm1377_vm3, %v1751_v47  ;;  %1431 = vst.msk [vmem:[%s2155_s23 + $0xd4] sm:$0xf] %vm1377_vm3, %v1783_v48  ;;  %v1079_v53 = vmax.f32 %v891_v49, 0.0  ;;  %v1111_v54 = vmax.f32 %v1019_v50, 0.0 }
 0x151   : > { %v893_v55 = vpop.f32.mrf.mxu0  ;;  %v1021_v56 = vpop.f32.mrf.mxu1 }
 0x152   : > { %v1752_v57 = vpack.c.bf16 %v1079_v53, %v1079_v53  ;;  %v1784_v58 = vpack.c.bf16 %v1111_v54, %v1111_v54  ;;  %v894_v59 = vadd.f32 %v2147_v15, %v893_v55  ;;  %v1022_v60 = vadd.f32 %v2147_v15, %v1021_v56 }
 0x153   : > { %v895_v61 = vpop.f32.mrf.mxu0  ;;  %v1023_v62 = vpop.f32.mrf.mxu1 }
 0x154   : > { %1400 = vst.msk [vmem:[%s2155_s23 + $0x58] sm:$0xf] %vm1377_vm3, %v1752_v57  ;;  %1432 = vst.msk [vmem:[%s2155_s23 + $0xd8] sm:$0xf] %vm1377_vm3, %v1784_v58  ;;  %v1080_v63 = vmax.f32 %v894_v59, 0.0  ;;  %v1112_v0 = vmax.f32 %v1022_v60, 0.0 }
 0x155   : > { %v898_v1 = vpop.f32.mrf.mxu0  ;;  %v1026_v2 = vpop.f32.mrf.mxu1 }
 0x156   : > { %v1753_v3 = vpack.c.bf16 %v1080_v63, %v1080_v63  ;;  %v1785_v4 = vpack.c.bf16 %v1112_v0, %v1112_v0  ;;  %v899_v5 = vadd.f32 %v2147_v15, %v898_v1  ;;  %v1027_v6 = vadd.f32 %v2147_v15, %v1026_v2 }
 0x157   : > { %v900_v7 = vpop.f32.mrf.mxu0  ;;  %v1028_v8 = vpop.f32.mrf.mxu1 }
 0x158   : > { %1401 = vst.msk [vmem:[%s2155_s23 + $0x5c] sm:$0xf] %vm1377_vm3, %v1753_v3  ;;  %1433 = vst.msk [vmem:[%s2155_s23 + $0xdc] sm:$0xf] %vm1377_vm3, %v1785_v4  ;;  %v1081_v9 = vmax.f32 %v899_v5, 0.0  ;;  %v1113_v10 = vmax.f32 %v1027_v6, 0.0 }
 0x159   : > { %v901_v11 = vpop.f32.mrf.mxu0  ;;  %v1029_v12 = vpop.f32.mrf.mxu1 }
 0x15a   : > { %v1754_v13 = vpack.c.bf16 %v1081_v9, %v1081_v9  ;;  %v1786_v14 = vpack.c.bf16 %v1113_v10, %v1113_v10  ;;  %v902_v16 = vadd.f32 %v2147_v15, %v901_v11  ;;  %v1030_v17 = vadd.f32 %v2147_v15, %v1029_v12 }
 0x15b   : > { %v903_v18 = vpop.f32.mrf.mxu0  ;;  %v1031_v19 = vpop.f32.mrf.mxu1 }
 0x15c   : > { %1402 = vst.msk [vmem:[%s2155_s23 + $0x60] sm:$0xf] %vm1377_vm3, %v1754_v13  ;;  %1434 = vst.msk [vmem:[%s2155_s23 + $0xe0] sm:$0xf] %vm1377_vm3, %v1786_v14  ;;  %v1082_v20 = vmax.f32 %v902_v16, 0.0  ;;  %v1114_v21 = vmax.f32 %v1030_v17, 0.0 }
 0x15d   : > { %v906_v22 = vpop.f32.mrf.mxu0  ;;  %v1034_v23 = vpop.f32.mrf.mxu1 }
 0x15e   : > { %v1755_v24 = vpack.c.bf16 %v1082_v20, %v1082_v20  ;;  %v1787_v25 = vpack.c.bf16 %v1114_v21, %v1114_v21  ;;  %v907_v26 = vadd.f32 %v2147_v15, %v906_v22  ;;  %v1035_v27 = vadd.f32 %v2147_v15, %v1034_v23 }
 0x15f   : > { %v908_v28 = vpop.f32.mrf.mxu0  ;;  %v1036_v29 = vpop.f32.mrf.mxu1 }
 0x160   : > { %1403 = vst.msk [vmem:[%s2155_s23 + $0x64] sm:$0xf] %vm1377_vm3, %v1755_v24  ;;  %1435 = vst.msk [vmem:[%s2155_s23 + $0xe4] sm:$0xf] %vm1377_vm3, %v1787_v25  ;;  %v1083_v30 = vmax.f32 %v907_v26, 0.0  ;;  %v1115_v31 = vmax.f32 %v1035_v27, 0.0 }
 0x161   : > { %v909_v32 = vpop.f32.mrf.mxu0  ;;  %v1037_v33 = vpop.f32.mrf.mxu1 }
 0x162   : > { %v1756_v34 = vpack.c.bf16 %v1083_v30, %v1083_v30  ;;  %v1788_v35 = vpack.c.bf16 %v1115_v31, %v1115_v31  ;;  %v910_v36 = vadd.f32 %v2147_v15, %v909_v32  ;;  %v1038_v37 = vadd.f32 %v2147_v15, %v1037_v33 }
 0x163   : > { %v911_v38 = vpop.f32.mrf.mxu0  ;;  %v1039_v39 = vpop.f32.mrf.mxu1 }
 0x164   : > { %1404 = vst.msk [vmem:[%s2155_s23 + $0x68] sm:$0xf] %vm1377_vm3, %v1756_v34  ;;  %1436 = vst.msk [vmem:[%s2155_s23 + $0xe8] sm:$0xf] %vm1377_vm3, %v1788_v35  ;;  %v1084_v40 = vmax.f32 %v910_v36, 0.0  ;;  %v1116_v41 = vmax.f32 %v1038_v37, 0.0 }
 0x165   : > { %v914_v42 = vpop.f32.mrf.mxu0  ;;  %v1042_v43 = vpop.f32.mrf.mxu1 }
 0x166   : > { %v1757_v44 = vpack.c.bf16 %v1084_v40, %v1084_v40  ;;  %v1789_v45 = vpack.c.bf16 %v1116_v41, %v1116_v41  ;;  %v915_v46 = vadd.f32 %v2147_v15, %v914_v42  ;;  %v1043_v47 = vadd.f32 %v2147_v15, %v1042_v43 }
 0x167   : > { %v916_v48 = vpop.f32.mrf.mxu0  ;;  %v1044_v49 = vpop.f32.mrf.mxu1 }
 0x168   : > { %1405 = vst.msk [vmem:[%s2155_s23 + $0x6c] sm:$0xf] %vm1377_vm3, %v1757_v44  ;;  %1437 = vst.msk [vmem:[%s2155_s23 + $0xec] sm:$0xf] %vm1377_vm3, %v1789_v45  ;;  %v1085_v50 = vmax.f32 %v915_v46, 0.0  ;;  %v1117_v51 = vmax.f32 %v1043_v47, 0.0 }
 0x169   : > { %v917_v52 = vpop.f32.mrf.mxu0  ;;  %v1045_v53 = vpop.f32.mrf.mxu1 }
 0x16a   : > { %v1758_v54 = vpack.c.bf16 %v1085_v50, %v1085_v50  ;;  %v1790_v55 = vpack.c.bf16 %v1117_v51, %v1117_v51  ;;  %v918_v56 = vadd.f32 %v2147_v15, %v917_v52  ;;  %v1046_v57 = vadd.f32 %v2147_v15, %v1045_v53 }
 0x16b   : > { %v919_v58 = vpop.f32.mrf.mxu0  ;;  %v1047_v59 = vpop.f32.mrf.mxu1 }
 0x16c   : > { %1406 = vst.msk [vmem:[%s2155_s23 + $0x70] sm:$0xf] %vm1377_vm3, %v1758_v54  ;;  %1438 = vst.msk [vmem:[%s2155_s23 + $0xf0] sm:$0xf] %vm1377_vm3, %v1790_v55  ;;  %v1086_v60 = vmax.f32 %v918_v56, 0.0  ;;  %v1118_v61 = vmax.f32 %v1046_v57, 0.0 }
 0x16d   : > { %v922_v62 = vpop.f32.mrf.mxu0  ;;  %v1050_v63 = vpop.f32.mrf.mxu1 }
 0x16e   : > { %v1759_v0 = vpack.c.bf16 %v1086_v60, %v1086_v60  ;;  %v1791_v1 = vpack.c.bf16 %v1118_v61, %v1118_v61  ;;  %v923_v2 = vadd.f32 %v2147_v15, %v922_v62  ;;  %v1051_v3 = vadd.f32 %v2147_v15, %v1050_v63 }
 0x16f   : > { %v924_v4 = vpop.f32.mrf.mxu0  ;;  %v1052_v5 = vpop.f32.mrf.mxu1 }
 0x170   : > { %1407 = vst.msk [vmem:[%s2155_s23 + $0x74] sm:$0xf] %vm1377_vm3, %v1759_v0  ;;  %1439 = vst.msk [vmem:[%s2155_s23 + $0xf4] sm:$0xf] %vm1377_vm3, %v1791_v1  ;;  %v1087_v6 = vmax.f32 %v923_v2, 0.0  ;;  %v1119_v7 = vmax.f32 %v1051_v3, 0.0 }
 0x171   : > { %v925_v8 = vpop.f32.mrf.mxu0  ;;  %v1053_v9 = vpop.f32.mrf.mxu1 }
 0x172   : > { %v1760_v10 = vpack.c.bf16 %v1087_v6, %v1087_v6  ;;  %v1792_v11 = vpack.c.bf16 %v1119_v7, %v1119_v7  ;;  %v926_v12 = vadd.f32 %v2147_v15, %v925_v8  ;;  %v1054_v13 = vadd.f32 %v2147_v15, %v1053_v9 }
 0x173   : > { %v927_v14 = vpop.f32.mrf.mxu0  ;;  %v1055_v16 = vpop.f32.mrf.mxu1 }
 0x174   : > { %1408 = vst.msk [vmem:[%s2155_s23 + $0x78] sm:$0xf] %vm1377_vm3, %v1760_v10  ;;  %1440 = vst.msk [vmem:[%s2155_s23 + $0xf8] sm:$0xf] %vm1377_vm3, %v1792_v11  ;;  %v1088_v17 = vmax.f32 %v926_v12, 0.0  ;;  %v1120_v18 = vmax.f32 %v1054_v13, 0.0 }
 0x176   : > { %v1761_v19 = vpack.c.bf16 %v1088_v17, %v1088_v17  ;;  %v1793_v20 = vpack.c.bf16 %v1120_v18, %v1120_v18 }
 0x178   : > { %1409 = vst.msk [vmem:[%s2155_s23 + $0x7c] sm:$0xf] %vm1377_vm3, %v1761_v19  ;;  %1441 = vst.msk [vmem:[%s2155_s23 + $0xfc] sm:$0xf] %vm1377_vm3, %v1793_v20 }
 0x179 PF: > { %s13_s14 = sadd.s32 1, %s1968_s14   ;;  %s2360_s12 = smov %s1964_s13 }
 0x17a   : > { %p10_p5 = scmp.ge.s32.totalorder %s13_s14, 6   ;;  %s2361_s13 = smov %s2363_s15 }
 0x17c   :  { %12 = sbr.rel (!%p10_p5) target bundleno = 2 (0x2), region = 68 }

</bundles_post_ra>
